<compile_context>
chip_gen: v6e
topology: v6e:2x2x1
jax: 0.10.0
libtpu: 0.0.40
codegen_flags: <defaults>
</compile_context>

<pallas_src>
import functools

import numpy as np
import jax
import jax.numpy as jnp
from jax.experimental import pallas as pl
from jax.experimental.pallas import tpu as pltpu


# --------------------------------------------------------------------------- #
# Pallas kernel: one batch element per grid step.
# --------------------------------------------------------------------------- #
def _pseudoformer_kernel(qx_ref, kx_ref, vx_ref,
                         wpa_ref, bpa_ref,
                         wq_ref, bq_ref,
                         wk_ref, bk_ref,
                         wv_ref, bv_ref,
                         wo_ref, bo_ref,
                         posk_ref, posb_ref,
                         z_ref, pscore_ref, scores_ref,
                         *, multiNum, dk, dkEnhance, scale):
    """Refs (per grid step b):
      qx/kx/vx : (1, L, C)   inputs for this batch element
      wpa      : (C, P)      pseudoAttn weight (transposed), bpa (1, P)
      wq/wk    : (C, M*dh)   query/key projections, biases (1, M*dh)
      wv       : (C, M*dk)   value projection, bias (1, M*dk)
      wo       : (M*dk, C)   output projection, bias (1, C)
      posk/b   : (M, L, L)   relative-position K / B tables
      z        : (1, L, C)   output features
      pscore   : (1, L, P)   pre-softmax pseudo-token scores (returned by module)
      scores   : (1, M, L, P) pre-softmax attention scores (returned by module)
    """
    _, L, C = qx_ref.shape
    qx = qx_ref[0]                                              # (L, C)
    kx = kx_ref[0]
    vx = vx_ref[0]

    # ---- pseudo-token attention ------------------------------------------
    pscore = jnp.dot(vx, wpa_ref[...],
                     preferred_element_type=jnp.float32) + bpa_ref[...]   # (L, P)
    pscore_ref[0] = pscore

    # softmax over the sequence axis (dim=1 in PyTorch == axis 0 here)
    pmax = jnp.max(pscore, axis=0, keepdims=True)
    pexp = jnp.exp(pscore - pmax)
    palpha = pexp / jnp.sum(pexp, axis=0, keepdims=True)        # (L, P)

    # pooled keys / values: pAlpha^T @ {kx, vx}  -> (P, C)
    cdims = (((0,), (0,)), ((), ()))
    kx_p = jax.lax.dot_general(palpha, kx, cdims,
                               preferred_element_type=jnp.float32)
    vx_p = jax.lax.dot_general(palpha, vx, cdims,
                               preferred_element_type=jnp.float32)

    # ---- projections (hoisted, single matmuls) ----------------------------
    q = jnp.dot(qx, wq_ref[...],
                preferred_element_type=jnp.float32) + bq_ref[...]    # (L, M*dh)
    k = jnp.dot(kx_p, wk_ref[...],
                preferred_element_type=jnp.float32) + bk_ref[...]    # (P, M*dh)
    v = jnp.dot(vx_p, wv_ref[...],
                preferred_element_type=jnp.float32) + bv_ref[...]    # (P, M*dk)

    wo = wo_ref[...]                                                 # (M*dk, C)
    dh = dk * dkEnhance
    z = jnp.zeros((L, C), jnp.float32)

    # ---- per-head attention (static loop, fused WO accumulation) ----------
    for m in range(multiNum):
        qm = q[:, m * dh:(m + 1) * dh]                               # (L, dh)
        km = k[:, m * dh:(m + 1) * dh]                               # (P, dh)
        vm = v[:, m * dk:(m + 1) * dk]                               # (P, dk)

        sm = jax.lax.dot_general(qm, km, (((1,), (1,)), ((), ())),
                                 preferred_element_type=jnp.float32) * scale  # (L, P)

        # relative-position modulation: scores * (posK @ pAlpha) + posB @ pAlpha
        relK = jnp.dot(posk_ref[m], palpha, preferred_element_type=jnp.float32)
        relB = jnp.dot(posb_ref[m], palpha, preferred_element_type=jnp.float32)
        sm = sm * relK + relB
        scores_ref[0, m] = sm

        # softmax over pseudo tokens (last axis)
        smax = jnp.max(sm, axis=-1, keepdims=True)
        sexp = jnp.exp(sm - smax)
        alpha = sexp / jnp.sum(sexp, axis=-1, keepdims=True)         # (L, P)

        zm = jnp.dot(alpha, vm, preferred_element_type=jnp.float32)  # (L, dk)
        z = z + jnp.dot(zm, wo[m * dk:(m + 1) * dk, :],
                        preferred_element_type=jnp.float32)          # (L, C)

    z_ref[0] = z + bo_ref[...]


# --------------------------------------------------------------------------- #
# pallas_call wrapper
# --------------------------------------------------------------------------- #
def pseudoformer_attention(qx, kx, vx,
                           wpa, bpa, wq, bq, wk, bk, wv, bv, wo, bo,
                           posK, posB,
                           *, multiNum, dk, dkEnhance, pseudoTknNum):
    B, L, C = qx.shape
    P = pseudoTknNum
    M = multiNum
    dh = dk * dkEnhance
    mdh = M * dh
    mdk = M * dk
    scale = 1.0 / np.sqrt(dk)

    kernel = functools.partial(_pseudoformer_kernel, multiNum=M, dk=dk,
                               dkEnhance=dkEnhance, scale=scale)

    def batched3(shape):                     # per-batch (1, d1, d2) tiles
        return pl.BlockSpec((1,) + shape, lambda b: (b, 0, 0))

    def full2(shape):                        # weights, resident across grid
        return pl.BlockSpec(shape, lambda b: (0, 0))

    def full3(shape):
        return pl.BlockSpec(shape, lambda b: (0, 0, 0))

    in_specs = [
        batched3((L, C)), batched3((L, C)), batched3((L, C)),
        full2((C, P)), full2((1, P)),
        full2((C, mdh)), full2((1, mdh)),
        full2((C, mdh)), full2((1, mdh)),
        full2((C, mdk)), full2((1, mdk)),
        full2((mdk, C)), full2((1, C)),
        full3((M, L, L)), full3((M, L, L)),
    ]
    out_specs = (
        pl.BlockSpec((1, L, C), lambda b: (b, 0, 0)),
        pl.BlockSpec((1, L, P), lambda b: (b, 0, 0)),
        pl.BlockSpec((1, M, L, P), lambda b: (b, 0, 0, 0)),
    )
    out_shape = (
        jax.ShapeDtypeStruct((B, L, C), jnp.float32),
        jax.ShapeDtypeStruct((B, L, P), jnp.float32),
        jax.ShapeDtypeStruct((B, M, L, P), jnp.float32),
    )

    f32 = jnp.float32
    z, pscore, scores = pl.pallas_call(
        kernel,
        grid=(B,),
        in_specs=in_specs,
        out_specs=out_specs,
        out_shape=out_shape,
        compiler_params=pltpu.CompilerParams(
            dimension_semantics=("parallel",)),
    )(qx.astype(f32), kx.astype(f32), vx.astype(f32),
      wpa.astype(f32), bpa.astype(f32),
      wq.astype(f32), bq.astype(f32),
      wk.astype(f32), bk.astype(f32),
      wv.astype(f32), bv.astype(f32),
      wo.astype(f32), bo.astype(f32),
      posK.astype(f32), posB.astype(f32))
    return z, pscore, scores


# --------------------------------------------------------------------------- #
# Module wrapper (forward pass only, eval mode)
# --------------------------------------------------------------------------- #
class SelfAttentionPseudoformer:
    """JAX/Pallas port of the PyTorch SelfAttention_Pseudoformer forward."""

    def __init__(self, pseudoTknNum, feaSize, dk, multiNum, maxRelativeDist=7,
                 dkEnhance=1, dropout=0.1, name='selfAttn', key=None):
        self.pseudoTknNum = pseudoTknNum
        self.feaSize = feaSize
        self.dk = dk
        self.multiNum = multiNum
        self.maxRelativeDist = maxRelativeDist
        self.dkEnhance = dkEnhance
        self.name = name
        # TODO(synk): dropout is treated as identity (inference / eval mode).

        if key is None:
            key = jax.random.PRNGKey(0)
        keys = jax.random.split(key, 12)

        def linear(kw, kb, fan_in, fan_out):
            bound = 1.0 / np.sqrt(fan_in)
            w = jax.random.uniform(kw, (fan_out, fan_in), jnp.float32, -bound, bound)
            b = jax.random.uniform(kb, (fan_out,), jnp.float32, -bound, bound)
            return w, b

        dh_out = dkEnhance * dk * multiNum
        self.Wpa, self.bpa = linear(keys[0], keys[1], feaSize, pseudoTknNum)
        self.WQ, self.bQ = linear(keys[2], keys[3], feaSize, dh_out)
        self.WK, self.bK = linear(keys[4], keys[5], feaSize, dh_out)
        self.WV, self.bV = linear(keys[6], keys[7], feaSize, dk * multiNum)
        self.WO, self.bO = linear(keys[8], keys[9], dk * multiNum, feaSize)
        if maxRelativeDist > 0:
            self.embK = jax.random.normal(keys[10],
                                          (2 * maxRelativeDist + 1, multiNum),
                                          jnp.float32)
            self.embB = jax.random.normal(keys[11],
                                          (2 * maxRelativeDist + 1, multiNum),
                                          jnp.float32)

    # relative-position tables (static glue, precomputed outside the kernel)
    def _rel_pos_tables(self, L):
        M = self.multiNum
        if self.maxRelativeDist <= 0:
            return (jnp.ones((M, L, L), jnp.float32),
                    jnp.zeros((M, L, L), jnp.float32))
        md = float(self.maxRelativeDist)
        idx = jnp.arange(L)
        dist = jnp.abs(idx[:, None] - idx[None, :]).astype(jnp.float32)
        over = dist > md
        dist = jnp.where(over, md + jnp.log2(jnp.where(over, dist - md, 1.0)), dist)
        table = jnp.clip(dist, 0.0, 2.0 * md).astype(jnp.int32)        # (L, L)
        posK = jnp.transpose(self.embK[table], (2, 0, 1))               # (M, L, L)
        posB = jnp.transpose(self.embB[table], (2, 0, 1))
        return posK, posB

    def __call__(self, qx, kx, vx, preScores=None, maskPAD=None):
        if preScores is not None or maskPAD is not None:
            # TODO(synk): preScores / maskPAD paths not implemented (defaults None).
            raise NotImplementedError("preScores / maskPAD not supported")
        B, L, C = qx.shape
        posK, posB = self._rel_pos_tables(L)
        z, pscore, scores = pseudoformer_attention(
            qx, kx, vx,
            self.Wpa.T, self.bpa[None, :],
            self.WQ.T, self.bQ[None, :],
            self.WK.T, self.bK[None, :],
            self.WV.T, self.bV[None, :],
            self.WO.T, self.bO[None, :],
            posK, posB,
            multiNum=self.multiNum, dk=self.dk,
            dkEnhance=self.dkEnhance, pseudoTknNum=self.pseudoTknNum)
        return z, (pscore, scores)


# --------------------------------------------------------------------------- #
# Pure-JAX reference (mirrors the PyTorch forward, eval mode)
# --------------------------------------------------------------------------- #
def pseudoformer_reference(m, qx, kx, vx):
    P, dk, M, dkE = m.pseudoTknNum, m.dk, m.multiNum, m.dkEnhance
    B, L, C = qx.shape
    pScore = vx @ m.Wpa.T + m.bpa                                   # (B, L, P)
    pAlpha = jax.nn.softmax(pScore, axis=1)
    kx2 = jnp.einsum('blp,blc->bpc', pAlpha, kx)                    # (B, P, C)
    vx2 = jnp.einsum('blp,blc->bpc', pAlpha, vx)
    q = (qx @ m.WQ.T + m.bQ).reshape(B, L, M, dk * dkE).transpose(0, 2, 1, 3)
    k = (kx2 @ m.WK.T + m.bK).reshape(B, P, M, dk * dkE).transpose(0, 2, 1, 3)
    v = (vx2 @ m.WV.T + m.bV).reshape(B, P, M, dk).transpose(0, 2, 1, 3)
    scores = jnp.einsum('bmld,bmpd->bmlp', q, k) / np.sqrt(dk)
    if m.maxRelativeDist > 0:
        posK, posB = m._rel_pos_tables(L)                           # (M, L, L)
        relK = jnp.einsum('mlk,bkp->bmlp', posK, pAlpha)
        relB = jnp.einsum('mlk,bkp->bmlp', posB, pAlpha)
        scores = scores * relK + relB
    alpha = jax.nn.softmax(scores, axis=3)
    z = jnp.einsum('bmlp,bmpd->bmld', alpha, v)
    z = z.transpose(0, 2, 1, 3).reshape(B, L, M * dk)
    z = z @ m.WO.T + m.bO
    return z, (pScore, scores)


# --------------------------------------------------------------------------- #
# main
# --------------------------------------------------------------------------- #
if __name__ == "__main__":
    B, L, C = 2, 16, 32            # batch, sequence length, feaSize
    P, dk, M = 8, 8, 4             # pseudoTknNum, dk, multiNum

    key = jax.random.PRNGKey(0)
    kq, kk, kv, kp = jax.random.split(key, 4)
    qx = jax.random.normal(kq, (B, L, C), jnp.float32)
    kx = jax.random.normal(kk, (B, L, C), jnp.float32)
    vx = jax.random.normal(kv, (B, L, C), jnp.float32)

    model = SelfAttentionPseudoformer(pseudoTknNum=P, feaSize=C, dk=dk,
                                      multiNum=M, maxRelativeDist=7,
                                      dkEnhance=1, key=kp)

    z, (pscore, scores) = model(qx, kx, vx)
    z = jax.block_until_ready(z)
    assert z.shape == (B, L, C), z.shape
    assert pscore.shape == (B, L, P), pscore.shape
    assert scores.shape == (B, M, L, P), scores.shape

    z_ref, (ps_ref, sc_ref) = pseudoformer_reference(model, qx, kx, vx)
    z_ref = jax.block_until_ready(z_ref)
    np.testing.assert_allclose(np.asarray(pscore), np.asarray(ps_ref),
                               rtol=1e-4, atol=1e-4)
    np.testing.assert_allclose(np.asarray(scores), np.asarray(sc_ref),
                               rtol=1e-4, atol=1e-4)
    np.testing.assert_allclose(np.asarray(z), np.asarray(z_ref),
                               rtol=1e-4, atol=1e-4)

    print("KERNEL_OK")
</pallas_src>

<mosaic_0001>
module attributes {stable_mosaic.version = 11 : i64} {
  func.func @_pseudoformer_kernel(%arg0: i32, %arg1: memref<1x16x32xf32, #tpu.memory_space<vmem>>, %arg2: memref<1x16x32xf32, #tpu.memory_space<vmem>>, %arg3: memref<1x16x32xf32, #tpu.memory_space<vmem>>, %arg4: memref<32x8xf32, #tpu.memory_space<vmem>>, %arg5: memref<1x8xf32, #tpu.memory_space<vmem>>, %arg6: memref<32x32xf32, #tpu.memory_space<vmem>>, %arg7: memref<1x32xf32, #tpu.memory_space<vmem>>, %arg8: memref<32x32xf32, #tpu.memory_space<vmem>>, %arg9: memref<1x32xf32, #tpu.memory_space<vmem>>, %arg10: memref<32x32xf32, #tpu.memory_space<vmem>>, %arg11: memref<1x32xf32, #tpu.memory_space<vmem>>, %arg12: memref<32x32xf32, #tpu.memory_space<vmem>>, %arg13: memref<1x32xf32, #tpu.memory_space<vmem>>, %arg14: memref<4x16x16xf32, #tpu.memory_space<vmem>>, %arg15: memref<4x16x16xf32, #tpu.memory_space<vmem>>, %arg16: memref<1x16x32xf32, #tpu.memory_space<vmem>>, %arg17: memref<1x16x8xf32, #tpu.memory_space<vmem>>, %arg18: memref<1x4x16x8xf32, #tpu.memory_space<vmem>>) attributes {dimension_semantics = [#tpu.dimension_semantics<parallel>], iteration_bounds = array<i64: 2>, scalar_prefetch = 0 : i64, scratch_operands = 0 : i64, tpu.core_type = #tpu.core_type<tc>, window_params = [{transform_indices = @transform_0, window_bounds = array<i64: 1, 16, 32>}, {transform_indices = @transform_1, window_bounds = array<i64: 1, 16, 32>}, {transform_indices = @transform_2, window_bounds = array<i64: 1, 16, 32>}, {pipeline_mode = #tpu.pipeline_mode<synchronous>, transform_indices = @transform_3, window_bounds = array<i64: 32, 8>}, {pipeline_mode = #tpu.pipeline_mode<synchronous>, transform_indices = @transform_4, window_bounds = array<i64: 1, 8>}, {pipeline_mode = #tpu.pipeline_mode<synchronous>, transform_indices = @transform_5, window_bounds = array<i64: 32, 32>}, {pipeline_mode = #tpu.pipeline_mode<synchronous>, transform_indices = @transform_6, window_bounds = array<i64: 1, 32>}, {pipeline_mode = #tpu.pipeline_mode<synchronous>, transform_indices = @transform_7, window_bounds = array<i64: 32, 32>}, {pipeline_mode = #tpu.pipeline_mode<synchronous>, transform_indices = @transform_8, window_bounds = array<i64: 1, 32>}, {pipeline_mode = #tpu.pipeline_mode<synchronous>, transform_indices = @transform_9, window_bounds = array<i64: 32, 32>}, {pipeline_mode = #tpu.pipeline_mode<synchronous>, transform_indices = @transform_10, window_bounds = array<i64: 1, 32>}, {pipeline_mode = #tpu.pipeline_mode<synchronous>, transform_indices = @transform_11, window_bounds = array<i64: 32, 32>}, {pipeline_mode = #tpu.pipeline_mode<synchronous>, transform_indices = @transform_12, window_bounds = array<i64: 1, 32>}, {pipeline_mode = #tpu.pipeline_mode<synchronous>, transform_indices = @transform_13, window_bounds = array<i64: 4, 16, 16>}, {pipeline_mode = #tpu.pipeline_mode<synchronous>, transform_indices = @transform_14, window_bounds = array<i64: 4, 16, 16>}, {transform_indices = @transform_15, window_bounds = array<i64: 1, 16, 32>}, {transform_indices = @transform_16, window_bounds = array<i64: 1, 16, 8>}, {transform_indices = @transform_17, window_bounds = array<i64: 1, 4, 16, 8>}]} {
    %c0 = arith.constant 0 : index
    %c0_0 = arith.constant 0 : index
    %c0_1 = arith.constant 0 : index
    %0 = vector.load %arg1[%c0, %c0_0, %c0_1] : memref<1x16x32xf32, #tpu.memory_space<vmem>>, vector<1x16x32xf32>
    %1 = vector.shape_cast %0 : vector<1x16x32xf32> to vector<16x32xf32>
    %c0_2 = arith.constant 0 : index
    %c0_3 = arith.constant 0 : index
    %c0_4 = arith.constant 0 : index
    %2 = vector.load %arg2[%c0_2, %c0_3, %c0_4] : memref<1x16x32xf32, #tpu.memory_space<vmem>>, vector<1x16x32xf32>
    %3 = vector.shape_cast %2 : vector<1x16x32xf32> to vector<16x32xf32>
    %c0_5 = arith.constant 0 : index
    %c0_6 = arith.constant 0 : index
    %c0_7 = arith.constant 0 : index
    %4 = vector.load %arg3[%c0_5, %c0_6, %c0_7] : memref<1x16x32xf32, #tpu.memory_space<vmem>>, vector<1x16x32xf32>
    %5 = vector.shape_cast %4 : vector<1x16x32xf32> to vector<16x32xf32>
    %c0_8 = arith.constant 0 : index
    %c0_9 = arith.constant 0 : index
    %6 = vector.load %arg4[%c0_8, %c0_9] : memref<32x8xf32, #tpu.memory_space<vmem>>, vector<32x8xf32>
    %cst = arith.constant dense<0.000000e+00> : vector<16x8xf32>
    %7 = tpu.matmul %5, %6, %cst {dimension_numbers = #tpu.dot_dimension_numbers<[1], [0], [0], [1], [0, 0, 1, 1], [], []>} : vector<16x32xf32>, vector<32x8xf32>, vector<16x8xf32> -> vector<16x8xf32>
    %c0_10 = arith.constant 0 : index
    %c0_11 = arith.constant 0 : index
    %8 = vector.load %arg5[%c0_10, %c0_11] : memref<1x8xf32, #tpu.memory_space<vmem>>, vector<1x8xf32>
    %9 = vector.broadcast %8 : vector<1x8xf32> to vector<16x8xf32>
    %10 = arith.addf %7, %9 : vector<16x8xf32>
    %c0_12 = arith.constant 0 : index
    %c0_13 = arith.constant 0 : index
    %c0_14 = arith.constant 0 : index
    %11 = vector.load %arg17[%c0_12, %c0_13, %c0_14] : memref<1x16x8xf32, #tpu.memory_space<vmem>>, vector<1x16x8xf32>
    %12 = vector.shape_cast %11 : vector<1x16x8xf32> to vector<16x8xf32>
    %13 = vector.shape_cast %10 : vector<16x8xf32> to vector<1x16x8xf32>
    tpu.vector_store %arg17[%c0_12, %c0_13, %c0_14], %13 {strides = array<i32>} : memref<1x16x8xf32, #tpu.memory_space<vmem>>, vector<1x16x8xf32>,
    %cst_15 = arith.constant dense<0xFF800000> : vector<8xf32>
    %14 = vector.multi_reduction <maximumf>, %10, %cst_15 [0] : vector<16x8xf32> to vector<8xf32>
    %15 = vector.shape_cast %14 : vector<8xf32> to vector<1x8xf32>
    %16 = vector.broadcast %15 : vector<1x8xf32> to vector<16x8xf32>
    %17 = arith.subf %10, %16 : vector<16x8xf32>
    %18 = math.exp %17 : vector<16x8xf32>
    %cst_16 = arith.constant dense<0.000000e+00> : vector<8xf32>
    %19 = vector.multi_reduction <add>, %18, %cst_16 [0] : vector<16x8xf32> to vector<8xf32>
    %20 = vector.shape_cast %19 : vector<8xf32> to vector<1x8xf32>
    %21 = vector.broadcast %20 : vector<1x8xf32> to vector<16x8xf32>
    %22 = arith.divf %18, %21 : vector<16x8xf32>
    %cst_17 = arith.constant dense<0.000000e+00> : vector<8x32xf32>
    %23 = tpu.matmul %22, %3, %cst_17 {dimension_numbers = #tpu.dot_dimension_numbers<[0], [0], [1], [1], [0, 1, 1, 1], [], []>} : vector<16x8xf32>, vector<16x32xf32>, vector<8x32xf32> -> vector<8x32xf32>
    %cst_18 = arith.constant dense<0.000000e+00> : vector<8x32xf32>
    %24 = tpu.matmul %22, %5, %cst_18 {dimension_numbers = #tpu.dot_dimension_numbers<[0], [0], [1], [1], [0, 1, 1, 1], [], []>} : vector<16x8xf32>, vector<16x32xf32>, vector<8x32xf32> -> vector<8x32xf32>
    %c0_19 = arith.constant 0 : index
    %c0_20 = arith.constant 0 : index
    %25 = vector.load %arg6[%c0_19, %c0_20] : memref<32x32xf32, #tpu.memory_space<vmem>>, vector<32x32xf32>
    %cst_21 = arith.constant dense<0.000000e+00> : vector<16x32xf32>
    %26 = tpu.matmul %1, %25, %cst_21 {dimension_numbers = #tpu.dot_dimension_numbers<[1], [0], [0], [1], [0, 0, 1, 1], [], []>} : vector<16x32xf32>, vector<32x32xf32>, vector<16x32xf32> -> vector<16x32xf32>
    %c0_22 = arith.constant 0 : index
    %c0_23 = arith.constant 0 : index
    %27 = vector.load %arg7[%c0_22, %c0_23] : memref<1x32xf32, #tpu.memory_space<vmem>>, vector<1x32xf32>
    %28 = vector.broadcast %27 : vector<1x32xf32> to vector<16x32xf32>
    %29 = arith.addf %26, %28 : vector<16x32xf32>
    %c0_24 = arith.constant 0 : index
    %c0_25 = arith.constant 0 : index
    %30 = vector.load %arg8[%c0_24, %c0_25] : memref<32x32xf32, #tpu.memory_space<vmem>>, vector<32x32xf32>
    %cst_26 = arith.constant dense<0.000000e+00> : vector<8x32xf32>
    %31 = tpu.matmul %23, %30, %cst_26 {dimension_numbers = #tpu.dot_dimension_numbers<[1], [0], [0], [1], [0, 0, 1, 1], [], []>} : vector<8x32xf32>, vector<32x32xf32>, vector<8x32xf32> -> vector<8x32xf32>
    %c0_27 = arith.constant 0 : index
    %c0_28 = arith.constant 0 : index
    %32 = vector.load %arg9[%c0_27, %c0_28] : memref<1x32xf32, #tpu.memory_space<vmem>>, vector<1x32xf32>
    %33 = vector.broadcast %32 : vector<1x32xf32> to vector<8x32xf32>
    %34 = arith.addf %31, %33 : vector<8x32xf32>
    %c0_29 = arith.constant 0 : index
    %c0_30 = arith.constant 0 : index
    %35 = vector.load %arg10[%c0_29, %c0_30] : memref<32x32xf32, #tpu.memory_space<vmem>>, vector<32x32xf32>
    %cst_31 = arith.constant dense<0.000000e+00> : vector<8x32xf32>
    %36 = tpu.matmul %24, %35, %cst_31 {dimension_numbers = #tpu.dot_dimension_numbers<[1], [0], [0], [1], [0, 0, 1, 1], [], []>} : vector<8x32xf32>, vector<32x32xf32>, vector<8x32xf32> -> vector<8x32xf32>
    %c0_32 = arith.constant 0 : index
    %c0_33 = arith.constant 0 : index
    %37 = vector.load %arg11[%c0_32, %c0_33] : memref<1x32xf32, #tpu.memory_space<vmem>>, vector<1x32xf32>
    %38 = vector.broadcast %37 : vector<1x32xf32> to vector<8x32xf32>
    %39 = arith.addf %36, %38 : vector<8x32xf32>
    %c0_34 = arith.constant 0 : index
    %c0_35 = arith.constant 0 : index
    %40 = vector.load %arg12[%c0_34, %c0_35] : memref<32x32xf32, #tpu.memory_space<vmem>>, vector<32x32xf32>
    %cst_36 = arith.constant 0.000000e+00 : f32
    %41 = vector.broadcast %cst_36 : f32 to vector<16x32xf32>
    %42 = vector.extract_strided_slice %29 {offsets = [0, 0], sizes = [16, 8], strides = [1, 1]} : vector<16x32xf32> to vector<16x8xf32>
    %43 = vector.extract_strided_slice %34 {offsets = [0, 0], sizes = [8, 8], strides = [1, 1]} : vector<8x32xf32> to vector<8x8xf32>
    %44 = vector.extract_strided_slice %39 {offsets = [0, 0], sizes = [8, 8], strides = [1, 1]} : vector<8x32xf32> to vector<8x8xf32>
    %cst_37 = arith.constant dense<0.000000e+00> : vector<16x8xf32>
    %45 = tpu.matmul %42, %43, %cst_37 {dimension_numbers = #tpu.dot_dimension_numbers<[1], [1], [0], [0], [0, 0, 1, 0], [], []>} : vector<16x8xf32>, vector<8x8xf32>, vector<16x8xf32> -> vector<16x8xf32>
    %cst_38 = arith.constant 0.353553385 : f32
    %46 = vector.broadcast %cst_38 : f32 to vector<16x8xf32>
    %47 = arith.mulf %45, %46 : vector<16x8xf32>
    %c0_39 = arith.constant 0 : index
    %c0_40 = arith.constant 0 : index
    %c0_41 = arith.constant 0 : index
    %48 = vector.load %arg14[%c0_39, %c0_40, %c0_41] : memref<4x16x16xf32, #tpu.memory_space<vmem>>, vector<1x16x16xf32>
    %49 = vector.shape_cast %48 : vector<1x16x16xf32> to vector<16x16xf32>
    %cst_42 = arith.constant dense<0.000000e+00> : vector<16x8xf32>
    %50 = tpu.matmul %49, %22, %cst_42 {dimension_numbers = #tpu.dot_dimension_numbers<[1], [0], [0], [1], [0, 0, 1, 1], [], []>} : vector<16x16xf32>, vector<16x8xf32>, vector<16x8xf32> -> vector<16x8xf32>
    %c0_43 = arith.constant 0 : index
    %c0_44 = arith.constant 0 : index
    %c0_45 = arith.constant 0 : index
    %51 = vector.load %arg15[%c0_43, %c0_44, %c0_45] : memref<4x16x16xf32, #tpu.memory_space<vmem>>, vector<1x16x16xf32>
    %52 = vector.shape_cast %51 : vector<1x16x16xf32> to vector<16x16xf32>
    %cst_46 = arith.constant dense<0.000000e+00> : vector<16x8xf32>
    %53 = tpu.matmul %52, %22, %cst_46 {dimension_numbers = #tpu.dot_dimension_numbers<[1], [0], [0], [1], [0, 0, 1, 1], [], []>} : vector<16x16xf32>, vector<16x8xf32>, vector<16x8xf32> -> vector<16x8xf32>
    %54 = arith.mulf %47, %50 : vector<16x8xf32>
    %55 = arith.addf %54, %53 : vector<16x8xf32>
    %c0_47 = arith.constant 0 : index
    %c0_48 = arith.constant 0 : index
    %c0_49 = arith.constant 0 : index
    %c0_50 = arith.constant 0 : index
    %56 = vector.load %arg18[%c0_47, %c0_48, %c0_49, %c0_50] : memref<1x4x16x8xf32, #tpu.memory_space<vmem>>, vector<1x1x16x8xf32>
    %57 = vector.shape_cast %56 : vector<1x1x16x8xf32> to vector<16x8xf32>
    %58 = vector.shape_cast %55 : vector<16x8xf32> to vector<1x1x16x8xf32>
    tpu.vector_store %arg18[%c0_47, %c0_48, %c0_49, %c0_50], %58 {strides = array<i32>} : memref<1x4x16x8xf32, #tpu.memory_space<vmem>>, vector<1x1x16x8xf32>,
    %cst_51 = arith.constant dense<0xFF800000> : vector<16xf32>
    %59 = vector.multi_reduction <maximumf>, %55, %cst_51 [1] : vector<16x8xf32> to vector<16xf32>
    %60 = vector.shape_cast %59 : vector<16xf32> to vector<16x1xf32>
    %61 = vector.broadcast %60 : vector<16x1xf32> to vector<16x8xf32>
    %62 = arith.subf %55, %61 : vector<16x8xf32>
    %63 = math.exp %62 : vector<16x8xf32>
    %cst_52 = arith.constant dense<0.000000e+00> : vector<16xf32>
    %64 = vector.multi_reduction <add>, %63, %cst_52 [1] : vector<16x8xf32> to vector<16xf32>
    %65 = vector.shape_cast %64 : vector<16xf32> to vector<16x1xf32>
    %66 = vector.broadcast %65 : vector<16x1xf32> to vector<16x8xf32>
    %67 = arith.divf %63, %66 : vector<16x8xf32>
    %cst_53 = arith.constant dense<0.000000e+00> : vector<16x8xf32>
    %68 = tpu.matmul %67, %44, %cst_53 {dimension_numbers = #tpu.dot_dimension_numbers<[1], [0], [0], [1], [0, 0, 1, 1], [], []>} : vector<16x8xf32>, vector<8x8xf32>, vector<16x8xf32> -> vector<16x8xf32>
    %69 = vector.extract_strided_slice %40 {offsets = [0, 0], sizes = [8, 32], strides = [1, 1]} : vector<32x32xf32> to vector<8x32xf32>
    %cst_54 = arith.constant dense<0.000000e+00> : vector<16x32xf32>
    %70 = tpu.matmul %68, %69, %cst_54 {dimension_numbers = #tpu.dot_dimension_numbers<[1], [0], [0], [1], [0, 0, 1, 1], [], []>} : vector<16x8xf32>, vector<8x32xf32>, vector<16x32xf32> -> vector<16x32xf32>
    %71 = arith.addf %41, %70 : vector<16x32xf32>
    %72 = vector.extract_strided_slice %29 {offsets = [0, 8], sizes = [16, 8], strides = [1, 1]} : vector<16x32xf32> to vector<16x8xf32>
    %73 = vector.extract_strided_slice %34 {offsets = [0, 8], sizes = [8, 8], strides = [1, 1]} : vector<8x32xf32> to vector<8x8xf32>
    %74 = vector.extract_strided_slice %39 {offsets = [0, 8], sizes = [8, 8], strides = [1, 1]} : vector<8x32xf32> to vector<8x8xf32>
    %cst_55 = arith.constant dense<0.000000e+00> : vector<16x8xf32>
    %75 = tpu.matmul %72, %73, %cst_55 {dimension_numbers = #tpu.dot_dimension_numbers<[1], [1], [0], [0], [0, 0, 1, 0], [], []>} : vector<16x8xf32>, vector<8x8xf32>, vector<16x8xf32> -> vector<16x8xf32>
    %cst_56 = arith.constant 0.353553385 : f32
    %76 = vector.broadcast %cst_56 : f32 to vector<16x8xf32>
    %77 = arith.mulf %75, %76 : vector<16x8xf32>
    %c1 = arith.constant 1 : index
    %c0_57 = arith.constant 0 : index
    %c0_58 = arith.constant 0 : index
    %78 = vector.load %arg14[%c1, %c0_57, %c0_58] : memref<4x16x16xf32, #tpu.memory_space<vmem>>, vector<1x16x16xf32>
    %79 = vector.shape_cast %78 : vector<1x16x16xf32> to vector<16x16xf32>
    %cst_59 = arith.constant dense<0.000000e+00> : vector<16x8xf32>
    %80 = tpu.matmul %79, %22, %cst_59 {dimension_numbers = #tpu.dot_dimension_numbers<[1], [0], [0], [1], [0, 0, 1, 1], [], []>} : vector<16x16xf32>, vector<16x8xf32>, vector<16x8xf32> -> vector<16x8xf32>
    %c1_60 = arith.constant 1 : index
    %c0_61 = arith.constant 0 : index
    %c0_62 = arith.constant 0 : index
    %81 = vector.load %arg15[%c1_60, %c0_61, %c0_62] : memref<4x16x16xf32, #tpu.memory_space<vmem>>, vector<1x16x16xf32>
    %82 = vector.shape_cast %81 : vector<1x16x16xf32> to vector<16x16xf32>
    %cst_63 = arith.constant dense<0.000000e+00> : vector<16x8xf32>
    %83 = tpu.matmul %82, %22, %cst_63 {dimension_numbers = #tpu.dot_dimension_numbers<[1], [0], [0], [1], [0, 0, 1, 1], [], []>} : vector<16x16xf32>, vector<16x8xf32>, vector<16x8xf32> -> vector<16x8xf32>
    %84 = arith.mulf %77, %80 : vector<16x8xf32>
    %85 = arith.addf %84, %83 : vector<16x8xf32>
    %c0_64 = arith.constant 0 : index
    %c1_65 = arith.constant 1 : index
    %c0_66 = arith.constant 0 : index
    %c0_67 = arith.constant 0 : index
    %86 = vector.load %arg18[%c0_64, %c1_65, %c0_66, %c0_67] : memref<1x4x16x8xf32, #tpu.memory_space<vmem>>, vector<1x1x16x8xf32>
    %87 = vector.shape_cast %86 : vector<1x1x16x8xf32> to vector<16x8xf32>
    %88 = vector.shape_cast %85 : vector<16x8xf32> to vector<1x1x16x8xf32>
    tpu.vector_store %arg18[%c0_64, %c1_65, %c0_66, %c0_67], %88 {strides = array<i32>} : memref<1x4x16x8xf32, #tpu.memory_space<vmem>>, vector<1x1x16x8xf32>,
    %cst_68 = arith.constant dense<0xFF800000> : vector<16xf32>
    %89 = vector.multi_reduction <maximumf>, %85, %cst_68 [1] : vector<16x8xf32> to vector<16xf32>
    %90 = vector.shape_cast %89 : vector<16xf32> to vector<16x1xf32>
    %91 = vector.broadcast %90 : vector<16x1xf32> to vector<16x8xf32>
    %92 = arith.subf %85, %91 : vector<16x8xf32>
    %93 = math.exp %92 : vector<16x8xf32>
    %cst_69 = arith.constant dense<0.000000e+00> : vector<16xf32>
    %94 = vector.multi_reduction <add>, %93, %cst_69 [1] : vector<16x8xf32> to vector<16xf32>
    %95 = vector.shape_cast %94 : vector<16xf32> to vector<16x1xf32>
    %96 = vector.broadcast %95 : vector<16x1xf32> to vector<16x8xf32>
    %97 = arith.divf %93, %96 : vector<16x8xf32>
    %cst_70 = arith.constant dense<0.000000e+00> : vector<16x8xf32>
    %98 = tpu.matmul %97, %74, %cst_70 {dimension_numbers = #tpu.dot_dimension_numbers<[1], [0], [0], [1], [0, 0, 1, 1], [], []>} : vector<16x8xf32>, vector<8x8xf32>, vector<16x8xf32> -> vector<16x8xf32>
    %99 = vector.extract_strided_slice %40 {offsets = [8, 0], sizes = [8, 32], strides = [1, 1]} : vector<32x32xf32> to vector<8x32xf32>
    %cst_71 = arith.constant dense<0.000000e+00> : vector<16x32xf32>
    %100 = tpu.matmul %98, %99, %cst_71 {dimension_numbers = #tpu.dot_dimension_numbers<[1], [0], [0], [1], [0, 0, 1, 1], [], []>} : vector<16x8xf32>, vector<8x32xf32>, vector<16x32xf32> -> vector<16x32xf32>
    %101 = arith.addf %71, %100 : vector<16x32xf32>
    %102 = vector.extract_strided_slice %29 {offsets = [0, 16], sizes = [16, 8], strides = [1, 1]} : vector<16x32xf32> to vector<16x8xf32>
    %103 = vector.extract_strided_slice %34 {offsets = [0, 16], sizes = [8, 8], strides = [1, 1]} : vector<8x32xf32> to vector<8x8xf32>
    %104 = vector.extract_strided_slice %39 {offsets = [0, 16], sizes = [8, 8], strides = [1, 1]} : vector<8x32xf32> to vector<8x8xf32>
    %cst_72 = arith.constant dense<0.000000e+00> : vector<16x8xf32>
    %105 = tpu.matmul %102, %103, %cst_72 {dimension_numbers = #tpu.dot_dimension_numbers<[1], [1], [0], [0], [0, 0, 1, 0], [], []>} : vector<16x8xf32>, vector<8x8xf32>, vector<16x8xf32> -> vector<16x8xf32>
    %cst_73 = arith.constant 0.353553385 : f32
    %106 = vector.broadcast %cst_73 : f32 to vector<16x8xf32>
    %107 = arith.mulf %105, %106 : vector<16x8xf32>
    %c2 = arith.constant 2 : index
    %c0_74 = arith.constant 0 : index
    %c0_75 = arith.constant 0 : index
    %108 = vector.load %arg14[%c2, %c0_74, %c0_75] : memref<4x16x16xf32, #tpu.memory_space<vmem>>, vector<1x16x16xf32>
    %109 = vector.shape_cast %108 : vector<1x16x16xf32> to vector<16x16xf32>
    %cst_76 = arith.constant dense<0.000000e+00> : vector<16x8xf32>
    %110 = tpu.matmul %109, %22, %cst_76 {dimension_numbers = #tpu.dot_dimension_numbers<[1], [0], [0], [1], [0, 0, 1, 1], [], []>} : vector<16x16xf32>, vector<16x8xf32>, vector<16x8xf32> -> vector<16x8xf32>
    %c2_77 = arith.constant 2 : index
    %c0_78 = arith.constant 0 : index
    %c0_79 = arith.constant 0 : index
    %111 = vector.load %arg15[%c2_77, %c0_78, %c0_79] : memref<4x16x16xf32, #tpu.memory_space<vmem>>, vector<1x16x16xf32>
    %112 = vector.shape_cast %111 : vector<1x16x16xf32> to vector<16x16xf32>
    %cst_80 = arith.constant dense<0.000000e+00> : vector<16x8xf32>
    %113 = tpu.matmul %112, %22, %cst_80 {dimension_numbers = #tpu.dot_dimension_numbers<[1], [0], [0], [1], [0, 0, 1, 1], [], []>} : vector<16x16xf32>, vector<16x8xf32>, vector<16x8xf32> -> vector<16x8xf32>
    %114 = arith.mulf %107, %110 : vector<16x8xf32>
    %115 = arith.addf %114, %113 : vector<16x8xf32>
    %c0_81 = arith.constant 0 : index
    %c2_82 = arith.constant 2 : index
    %c0_83 = arith.constant 0 : index
    %c0_84 = arith.constant 0 : index
    %116 = vector.load %arg18[%c0_81, %c2_82, %c0_83, %c0_84] : memref<1x4x16x8xf32, #tpu.memory_space<vmem>>, vector<1x1x16x8xf32>
    %117 = vector.shape_cast %116 : vector<1x1x16x8xf32> to vector<16x8xf32>
    %118 = vector.shape_cast %115 : vector<16x8xf32> to vector<1x1x16x8xf32>
    tpu.vector_store %arg18[%c0_81, %c2_82, %c0_83, %c0_84], %118 {strides = array<i32>} : memref<1x4x16x8xf32, #tpu.memory_space<vmem>>, vector<1x1x16x8xf32>,
    %cst_85 = arith.constant dense<0xFF800000> : vector<16xf32>
    %119 = vector.multi_reduction <maximumf>, %115, %cst_85 [1] : vector<16x8xf32> to vector<16xf32>
    %120 = vector.shape_cast %119 : vector<16xf32> to vector<16x1xf32>
    %121 = vector.broadcast %120 : vector<16x1xf32> to vector<16x8xf32>
    %122 = arith.subf %115, %121 : vector<16x8xf32>
    %123 = math.exp %122 : vector<16x8xf32>
    %cst_86 = arith.constant dense<0.000000e+00> : vector<16xf32>
    %124 = vector.multi_reduction <add>, %123, %cst_86 [1] : vector<16x8xf32> to vector<16xf32>
    %125 = vector.shape_cast %124 : vector<16xf32> to vector<16x1xf32>
    %126 = vector.broadcast %125 : vector<16x1xf32> to vector<16x8xf32>
    %127 = arith.divf %123, %126 : vector<16x8xf32>
    %cst_87 = arith.constant dense<0.000000e+00> : vector<16x8xf32>
    %128 = tpu.matmul %127, %104, %cst_87 {dimension_numbers = #tpu.dot_dimension_numbers<[1], [0], [0], [1], [0, 0, 1, 1], [], []>} : vector<16x8xf32>, vector<8x8xf32>, vector<16x8xf32> -> vector<16x8xf32>
    %129 = vector.extract_strided_slice %40 {offsets = [16, 0], sizes = [8, 32], strides = [1, 1]} : vector<32x32xf32> to vector<8x32xf32>
    %cst_88 = arith.constant dense<0.000000e+00> : vector<16x32xf32>
    %130 = tpu.matmul %128, %129, %cst_88 {dimension_numbers = #tpu.dot_dimension_numbers<[1], [0], [0], [1], [0, 0, 1, 1], [], []>} : vector<16x8xf32>, vector<8x32xf32>, vector<16x32xf32> -> vector<16x32xf32>
    %131 = arith.addf %101, %130 : vector<16x32xf32>
    %132 = vector.extract_strided_slice %29 {offsets = [0, 24], sizes = [16, 8], strides = [1, 1]} : vector<16x32xf32> to vector<16x8xf32>
    %133 = vector.extract_strided_slice %34 {offsets = [0, 24], sizes = [8, 8], strides = [1, 1]} : vector<8x32xf32> to vector<8x8xf32>
    %134 = vector.extract_strided_slice %39 {offsets = [0, 24], sizes = [8, 8], strides = [1, 1]} : vector<8x32xf32> to vector<8x8xf32>
    %cst_89 = arith.constant dense<0.000000e+00> : vector<16x8xf32>
    %135 = tpu.matmul %132, %133, %cst_89 {dimension_numbers = #tpu.dot_dimension_numbers<[1], [1], [0], [0], [0, 0, 1, 0], [], []>} : vector<16x8xf32>, vector<8x8xf32>, vector<16x8xf32> -> vector<16x8xf32>
    %cst_90 = arith.constant 0.353553385 : f32
    %136 = vector.broadcast %cst_90 : f32 to vector<16x8xf32>
    %137 = arith.mulf %135, %136 : vector<16x8xf32>
    %c3 = arith.constant 3 : index
    %c0_91 = arith.constant 0 : index
    %c0_92 = arith.constant 0 : index
    %138 = vector.load %arg14[%c3, %c0_91, %c0_92] : memref<4x16x16xf32, #tpu.memory_space<vmem>>, vector<1x16x16xf32>
    %139 = vector.shape_cast %138 : vector<1x16x16xf32> to vector<16x16xf32>
    %cst_93 = arith.constant dense<0.000000e+00> : vector<16x8xf32>
    %140 = tpu.matmul %139, %22, %cst_93 {dimension_numbers = #tpu.dot_dimension_numbers<[1], [0], [0], [1], [0, 0, 1, 1], [], []>} : vector<16x16xf32>, vector<16x8xf32>, vector<16x8xf32> -> vector<16x8xf32>
    %c3_94 = arith.constant 3 : index
    %c0_95 = arith.constant 0 : index
    %c0_96 = arith.constant 0 : index
    %141 = vector.load %arg15[%c3_94, %c0_95, %c0_96] : memref<4x16x16xf32, #tpu.memory_space<vmem>>, vector<1x16x16xf32>
    %142 = vector.shape_cast %141 : vector<1x16x16xf32> to vector<16x16xf32>
    %cst_97 = arith.constant dense<0.000000e+00> : vector<16x8xf32>
    %143 = tpu.matmul %142, %22, %cst_97 {dimension_numbers = #tpu.dot_dimension_numbers<[1], [0], [0], [1], [0, 0, 1, 1], [], []>} : vector<16x16xf32>, vector<16x8xf32>, vector<16x8xf32> -> vector<16x8xf32>
    %144 = arith.mulf %137, %140 : vector<16x8xf32>
    %145 = arith.addf %144, %143 : vector<16x8xf32>
    %c0_98 = arith.constant 0 : index
    %c3_99 = arith.constant 3 : index
    %c0_100 = arith.constant 0 : index
    %c0_101 = arith.constant 0 : index
    %146 = vector.load %arg18[%c0_98, %c3_99, %c0_100, %c0_101] : memref<1x4x16x8xf32, #tpu.memory_space<vmem>>, vector<1x1x16x8xf32>
    %147 = vector.shape_cast %146 : vector<1x1x16x8xf32> to vector<16x8xf32>
    %148 = vector.shape_cast %145 : vector<16x8xf32> to vector<1x1x16x8xf32>
    tpu.vector_store %arg18[%c0_98, %c3_99, %c0_100, %c0_101], %148 {strides = array<i32>} : memref<1x4x16x8xf32, #tpu.memory_space<vmem>>, vector<1x1x16x8xf32>,
    %cst_102 = arith.constant dense<0xFF800000> : vector<16xf32>
    %149 = vector.multi_reduction <maximumf>, %145, %cst_102 [1] : vector<16x8xf32> to vector<16xf32>
    %150 = vector.shape_cast %149 : vector<16xf32> to vector<16x1xf32>
    %151 = vector.broadcast %150 : vector<16x1xf32> to vector<16x8xf32>
    %152 = arith.subf %145, %151 : vector<16x8xf32>
    %153 = math.exp %152 : vector<16x8xf32>
    %cst_103 = arith.constant dense<0.000000e+00> : vector<16xf32>
    %154 = vector.multi_reduction <add>, %153, %cst_103 [1] : vector<16x8xf32> to vector<16xf32>
    %155 = vector.shape_cast %154 : vector<16xf32> to vector<16x1xf32>
    %156 = vector.broadcast %155 : vector<16x1xf32> to vector<16x8xf32>
    %157 = arith.divf %153, %156 : vector<16x8xf32>
    %cst_104 = arith.constant dense<0.000000e+00> : vector<16x8xf32>
    %158 = tpu.matmul %157, %134, %cst_104 {dimension_numbers = #tpu.dot_dimension_numbers<[1], [0], [0], [1], [0, 0, 1, 1], [], []>} : vector<16x8xf32>, vector<8x8xf32>, vector<16x8xf32> -> vector<16x8xf32>
    %159 = vector.extract_strided_slice %40 {offsets = [24, 0], sizes = [8, 32], strides = [1, 1]} : vector<32x32xf32> to vector<8x32xf32>
    %cst_105 = arith.constant dense<0.000000e+00> : vector<16x32xf32>
    %160 = tpu.matmul %158, %159, %cst_105 {dimension_numbers = #tpu.dot_dimension_numbers<[1], [0], [0], [1], [0, 0, 1, 1], [], []>} : vector<16x8xf32>, vector<8x32xf32>, vector<16x32xf32> -> vector<16x32xf32>
    %161 = arith.addf %131, %160 : vector<16x32xf32>
    %c0_106 = arith.constant 0 : index
    %c0_107 = arith.constant 0 : index
    %162 = vector.load %arg13[%c0_106, %c0_107] : memref<1x32xf32, #tpu.memory_space<vmem>>, vector<1x32xf32>
    %163 = vector.broadcast %162 : vector<1x32xf32> to vector<16x32xf32>
    %164 = arith.addf %161, %163 : vector<16x32xf32>
    %c0_108 = arith.constant 0 : index
    %c0_109 = arith.constant 0 : index
    %c0_110 = arith.constant 0 : index
    %165 = vector.load %arg16[%c0_108, %c0_109, %c0_110] : memref<1x16x32xf32, #tpu.memory_space<vmem>>, vector<1x16x32xf32>
    %166 = vector.shape_cast %165 : vector<1x16x32xf32> to vector<16x32xf32>
    %167 = vector.shape_cast %164 : vector<16x32xf32> to vector<1x16x32xf32>
    tpu.vector_store %arg16[%c0_108, %c0_109, %c0_110], %167 {strides = array<i32>} : memref<1x16x32xf32, #tpu.memory_space<vmem>>, vector<1x16x32xf32>,
    return
  }
  func.func @transform_0(%arg0: i32) -> (i32, i32, i32) {
    %c0_i32 = arith.constant 0 : i32
    %c0_i32_0 = arith.constant 0 : i32
    %c0_i32_1 = arith.constant 0 : i32
    return %arg0, %c0_i32, %c0_i32_0 : i32, i32, i32
  }
  func.func @transform_1(%arg0: i32) -> (i32, i32, i32) {
    %c0_i32 = arith.constant 0 : i32
    %c0_i32_0 = arith.constant 0 : i32
    %c0_i32_1 = arith.constant 0 : i32
    return %arg0, %c0_i32, %c0_i32_0 : i32, i32, i32
  }
  func.func @transform_2(%arg0: i32) -> (i32, i32, i32) {
    %c0_i32 = arith.constant 0 : i32
    %c0_i32_0 = arith.constant 0 : i32
    %c0_i32_1 = arith.constant 0 : i32
    return %arg0, %c0_i32, %c0_i32_0 : i32, i32, i32
  }
  func.func @transform_3(%arg0: i32) -> (i32, i32) {
    %c0_i32 = arith.constant 0 : i32
    %c0_i32_0 = arith.constant 0 : i32
    %c0_i32_1 = arith.constant 0 : i32
    return %c0_i32, %c0_i32_0 : i32, i32
  }
  func.func @transform_4(%arg0: i32) -> (i32, i32) {
    %c0_i32 = arith.constant 0 : i32
    %c0_i32_0 = arith.constant 0 : i32
    %c0_i32_1 = arith.constant 0 : i32
    return %c0_i32, %c0_i32_0 : i32, i32
  }
  func.func @transform_5(%arg0: i32) -> (i32, i32) {
    %c0_i32 = arith.constant 0 : i32
    %c0_i32_0 = arith.constant 0 : i32
    %c0_i32_1 = arith.constant 0 : i32
    return %c0_i32, %c0_i32_0 : i32, i32
  }
  func.func @transform_6(%arg0: i32) -> (i32, i32) {
    %c0_i32 = arith.constant 0 : i32
    %c0_i32_0 = arith.constant 0 : i32
    %c0_i32_1 = arith.constant 0 : i32
    return %c0_i32, %c0_i32_0 : i32, i32
  }
  func.func @transform_7(%arg0: i32) -> (i32, i32) {
    %c0_i32 = arith.constant 0 : i32
    %c0_i32_0 = arith.constant 0 : i32
    %c0_i32_1 = arith.constant 0 : i32
    return %c0_i32, %c0_i32_0 : i32, i32
  }
  func.func @transform_8(%arg0: i32) -> (i32, i32) {
    %c0_i32 = arith.constant 0 : i32
    %c0_i32_0 = arith.constant 0 : i32
    %c0_i32_1 = arith.constant 0 : i32
    return %c0_i32, %c0_i32_0 : i32, i32
  }
  func.func @transform_9(%arg0: i32) -> (i32, i32) {
    %c0_i32 = arith.constant 0 : i32
    %c0_i32_0 = arith.constant 0 : i32
    %c0_i32_1 = arith.constant 0 : i32
    return %c0_i32, %c0_i32_0 : i32, i32
  }
  func.func @transform_10(%arg0: i32) -> (i32, i32) {
    %c0_i32 = arith.constant 0 : i32
    %c0_i32_0 = arith.constant 0 : i32
    %c0_i32_1 = arith.constant 0 : i32
    return %c0_i32, %c0_i32_0 : i32, i32
  }
  func.func @transform_11(%arg0: i32) -> (i32, i32) {
    %c0_i32 = arith.constant 0 : i32
    %c0_i32_0 = arith.constant 0 : i32
    %c0_i32_1 = arith.constant 0 : i32
    return %c0_i32, %c0_i32_0 : i32, i32
  }
  func.func @transform_12(%arg0: i32) -> (i32, i32) {
    %c0_i32 = arith.constant 0 : i32
    %c0_i32_0 = arith.constant 0 : i32
    %c0_i32_1 = arith.constant 0 : i32
    return %c0_i32, %c0_i32_0 : i32, i32
  }
  func.func @transform_13(%arg0: i32) -> (i32, i32, i32) {
    %c0_i32 = arith.constant 0 : i32
    %c0_i32_0 = arith.constant 0 : i32
    %c0_i32_1 = arith.constant 0 : i32
    %c0_i32_2 = arith.constant 0 : i32
    return %c0_i32, %c0_i32_0, %c0_i32_1 : i32, i32, i32
  }
  func.func @transform_14(%arg0: i32) -> (i32, i32, i32) {
    %c0_i32 = arith.constant 0 : i32
    %c0_i32_0 = arith.constant 0 : i32
    %c0_i32_1 = arith.constant 0 : i32
    %c0_i32_2 = arith.constant 0 : i32
    return %c0_i32, %c0_i32_0, %c0_i32_1 : i32, i32, i32
  }
  func.func @transform_15(%arg0: i32) -> (i32, i32, i32) {
    %c0_i32 = arith.constant 0 : i32
    %c0_i32_0 = arith.constant 0 : i32
    %c0_i32_1 = arith.constant 0 : i32
    return %arg0, %c0_i32, %c0_i32_0 : i32, i32, i32
  }
  func.func @transform_16(%arg0: i32) -> (i32, i32, i32) {
    %c0_i32 = arith.constant 0 : i32
    %c0_i32_0 = arith.constant 0 : i32
    %c0_i32_1 = arith.constant 0 : i32
    return %arg0, %c0_i32, %c0_i32_0 : i32, i32, i32
  }
  func.func @transform_17(%arg0: i32) -> (i32, i32, i32, i32) {
    %c0_i32 = arith.constant 0 : i32
    %c0_i32_0 = arith.constant 0 : i32
    %c0_i32_1 = arith.constant 0 : i32
    %c0_i32_2 = arith.constant 0 : i32
    return %arg0, %c0_i32, %c0_i32_0, %c0_i32_1 : i32, i32, i32, i32
  }
}

</mosaic_0001>

<bundles_post_ra>
// kernel: tpu_custom_call.1
= control target key start
LH: loop header
LB: loop body
LE: loop exit
PB: predicated region body
PF: predicated region fallthrough
CT: control target
= control target key end

     0   :  { %s5207_s0 = inlined_call_operand.hbm [shape: f32[2,16,32], index: 0, kind: input, shape index: {}]   ;;  %s5208_s1 = inlined_call_operand.hbm [shape: f32[2,16,32], index: 1, kind: input, shape index: {}]   ;;  %s5209_s2 = inlined_call_operand.hbm [shape: f32[2,16,32], index: 2, kind: input, shape index: {}]   ;;  %s5210_s3 = inlined_call_operand.vmem [shape: f32[32,8], index: 3, kind: input, shape index: {}]   ;;  %s5211_s4 = inlined_call_operand.vmem [shape: f32[1,8], index: 4, kind: input, shape index: {}]   ;;  %s5212_s5 = inlined_call_operand.hbm [shape: f32[32,32], index: 5, kind: input, shape index: {}]   ;;  %s5213_s6 = inlined_call_operand.hbm [shape: f32[1,32], index: 6, kind: input, shape index: {}]   ;;  %s5214_s7 = inlined_call_operand.hbm [shape: f32[32,32], index: 7, kind: input, shape index: {}]   ;;  %s5215_s8 = inlined_call_operand.hbm [shape: f32[1,32], index: 8, kind: input, shape index: {}]   ;;  %s5216_s9 = inlined_call_operand.hbm [shape: f32[32,32], index: 9, kind: input, shape index: {}]   ;;  %s5217_s10 = inlined_call_operand.hbm [shape: f32[1,32], index: 10, kind: input, shape index: {}]   ;;  %s5218_s11 = inlined_call_operand.hbm [shape: f32[32,32], index: 11, kind: input, shape index: {}]   ;;  %s5219_s12 = inlined_call_operand.hbm [shape: f32[1,32], index: 12, kind: input, shape index: {}]   ;;  %s5220_s13 = inlined_call_operand.hbm [shape: f32[4,16,16], index: 13, kind: input, shape index: {}]   ;;  %s5221_s14 = inlined_call_operand.vmem [shape: f32[4,16,16], index: 14, kind: input, shape index: {}]   ;;  %s5222_s15 = inlined_call_operand.hbm [shape: f32[2,16,32], index: 15, kind: output, shape index: {0}]   ;;  %s5223_s16 = inlined_call_operand.vmem [shape: f32[2,16,8], index: 16, kind: output, shape index: {1}]   ;;  %s5224_s17 = inlined_call_operand.vmem [shape: f32[2,4,16,8], index: 17, kind: output, shape index: {2}]  }
   0x1   :  { %5254 = sst [smem:[#allocation37_spill]] %s5207_s0 }
   0x2   :  { %5255 = sst [smem:[#allocation38_spill]] %s5208_s1 }
   0x3   :  { %5256 = sst [smem:[#allocation39_spill]] %s5211_s4 }
   0x4   :  { %5257 = sst [smem:[#allocation40_spill]] %s5212_s5 }
   0x5   :  { %5258 = sst [smem:[#allocation41_spill]] %s5213_s6 }
   0x6   :  { %5259 = sst [smem:[#allocation42_spill]] %s5214_s7 }
   0x7   :  { %5260 = sst [smem:[#allocation43_spill]] %s5215_s8 }
   0x8   :  { %5261 = sst [smem:[#allocation44_spill]] %s5216_s9 }
   0x9   :  { %5262 = sst [smem:[#allocation45_spill]] %s5218_s11 }
   0xa   :  { %5263 = sst [smem:[#allocation46_spill]] %s5221_s14 }
   0xb   :  { %5264 = sst [smem:[#allocation47_spill]] %s5222_s15 }
   0xc   :  { %5265 = sst [smem:[#allocation48_spill]] %s5223_s16 }
   0xd   :  { %5266 = sst [smem:[#allocation49_spill]] %s5224_s17 }
   0xe   :  { %23 = vsyncpa [#allocation3], 0 }
   0xf   :  { %25 = vsyncpa [#allocation3 + $0x1], 0 }
  0x10   :  { %26 = vsyncpa [#allocation6], 0 }
  0x11   :  { %28 = vsyncpa [#allocation6 + $0x1], 0 }
  0x12   :  { %29 = vsyncpa [#allocation9], 0 }
  0x13   :  { %30 = vsyncpa [#allocation12], 0 }
  0x14   :  { %31 = vsyncpa [#allocation15], 0 }
  0x15   :  { %32 = vsyncpa [#allocation18], 0 }
  0x16   :  { %33 = vsyncpa [#allocation21], 0 }
  0x17   :  { %34 = vsyncpa [#allocation4], 0 }
  0x18   :  { %36 = vsyncpa [#allocation4 + $0x1], 0  ;;  %s4557_s24 = smov 0   ;;  %s4559_s25 = smov 0  }
  0x19   :  { %s4561_s26 = smov 0   ;;  %s4563_s27 = smov 0  }
  0x1a LB: > { %5267 = sst [smem:[#allocation31_spill]] %s4431_s24  ;;  %s4445_s28 = smov [#allocation8]   ;;  %s4443_s27 = sphi %s4563_s27, %s5320_s27   ;;  %s4439_s26 = sphi %s4561_s26, %s5324_s26   ;;  %s4435_s25 = sphi %s4559_s25, %s5323_s25   ;;  %s4431_s24 = sphi %s4557_s24, %s5322_s24  }
  0x1b   : > { %5268 = sst [smem:[#allocation32_spill]] %s4443_s27  ;;  %s473_s29 = sshll.u32 %s4445_s28, 4  ;;  %s474_s29 = int_to_ptr.vmem [resolvable:$true] %s473_s29 }
  0x1c   : > { %s4578_s0 = sadd.s32 4294967295, %s4443_s27   ;;  %p3455_p0 = scmp.ge.s32.totalorder %s4443_s27, 1 }
  0x1d   : > { %p5242_p1 = scmp.eq.s32.totalorder %s4578_s0, 0  ;;  %p455_p2 = scmp.lt.s32.totalorder %s4443_s27, 3 }
  0x1e   : > { %s4446_s18 = smov [#allocation11]   ;;  %s4447_s20 = smov [#allocation14]  }
  0x1f   : > { %p4583_p3 = pnand %p3455_p0, %p455_p2  ;;  %s497_s19 = sshll.u32 %s4446_s18, 4  ;;  %s4596_s19 = int_to_ptr.vmem [resolvable:$true] %s497_s19 }
  0x20   : > { %s521_s21 = sshll.u32 %s4447_s20, 4  ;;  %s4048_s23 = scalar_lea.vmem %s474_s29, 512  ;;  %s4598_s21 = int_to_ptr.vmem [resolvable:$true] %s521_s21 }
  0x21   : > { %s5269_s30 = scalar_select %p4583_p3, 1, 0 }
  0x22   : > { %p3887_p5 = pneg %p4583_p3  ;;  %p4049_p8 = scmp.ne.s32.totalorder %s474_s29, %s4048_s23 }
  0x23   : > { %p4056_p11 = scmp.lt.s32.totalorder %s474_s29, %s474_s29  ;;  %p4057_p12 = scmp.lt.s32.totalorder %s4048_s23, %s4048_s23 }
  0x24   : > { %p4592_p6 = pnand %p3887_p5, %p5242_p1 }
  0x25   : > { %p4058_p13 = por %p4057_p12, %p4056_p11 }
  0x26   : > { %s5270_s1 = scalar_select %p4592_p6, 1, 0 }
  0x27   : > { %p4602_p7 = pneg %p4592_p6 }
  0x29   : > { %s5271_s22 = scalar_select %p4602_p7, 1, 0 }
  0x2a   : > { %p4051_p9 = pnand %p4049_p8, %p4602_p7 }
  0x2c   : > { %p4052_p10 = pneg %p4051_p9 }
  0x2e   : > { %p4059_p0 = pnand %p4058_p13, %p4052_p10 }
  0x30   : > { %4062 = shalt.err (!%p4059_p0)
}
  0x31   : > { %s5228_s28 = smov 128   ;;  %s5231_s18 = smov 8  }
  0x32   : > { %s5272_s5 = sld [smem:[#allocation40_spill]]  ;;  %s4074_s17 = scalar_lea.vmem %s4596_s19, 512 }
  0x33   : > { %p4075_p2 = scmp.ne.s32.totalorder %s4596_s19, %s4074_s17  ;;  %p4082_p9 = scmp.lt.s32.totalorder %s4596_s19, %s4596_s19 }
  0x34   : > { %p4083_p10 = scmp.lt.s32.totalorder %s4074_s17, %s4074_s17 }
  0x35   : > { %p4077_p5 = pnand %p4075_p2, %p4602_p7 }
  0x36   : > { %p4084_p11 = por %p4083_p10, %p4082_p9 }
  0x37   : > { %p4078_p8 = pneg %p4077_p5 }
  0x38   : > { %3890 = dma.hbm_to_vmem [thread:$0]  (!%p4592_p6), %s5272_s5, 512, %s474_s29, [#allocation9], %s5228_s28, %s5228_s28, %s5231_s18  }
  0x39   : > { %p4085_p12 = pnand %p4084_p11, %p4078_p8 }
  0x3b   : > { %4088 = shalt.err (!%p4085_p12)
}
  0x3c   : > { %s5273_s7 = sld [smem:[#allocation42_spill]]  ;;  %s4100_s29 = scalar_lea.vmem %s4598_s21, 512 }
  0x3d   : > { %p4101_p13 = scmp.ne.s32.totalorder %s4598_s21, %s4100_s29  ;;  %p4108_p5 = scmp.lt.s32.totalorder %s4598_s21, %s4598_s21 }
  0x3e   : > { %p4109_p8 = scmp.lt.s32.totalorder %s4100_s29, %s4100_s29 }
  0x3f   : > { %p4103_p0 = pnand %p4101_p13, %p4602_p7 }
  0x40   : > { %p4110_p9 = por %p4109_p8, %p4108_p5 }
  0x41   : > { %p4104_p2 = pneg %p4103_p0 }
  0x42   : > { %3896 = dma.hbm_to_vmem [thread:$0]  (!%p4592_p6), %s5273_s7, 512, %s4596_s19, [#allocation12], %s5228_s28, %s5228_s28, %s5231_s18  }
  0x43   : > { %p4111_p10 = pnand %p4110_p9, %p4104_p2 }
  0x45   : > { %4114 = shalt.err (!%p4111_p10)
}
  0x46   : > { %s5274_s9 = sld [smem:[#allocation44_spill]]  ;;  %s4450_s19 = smov [#allocation17]  }
  0x47   : > { %s545_s23 = sshll.u32 %s4450_s19, 4  ;;  %s546_s23 = int_to_ptr.vmem [resolvable:$true] %s545_s23 }
  0x48   : > { %s4126_s15 = scalar_lea.vmem %s546_s23, 512  ;;  %p4134_p0 = scmp.lt.s32.totalorder %s546_s23, %s546_s23 }
  0x49   : > { %p4127_p11 = scmp.ne.s32.totalorder %s546_s23, %s4126_s15  ;;  %p4135_p2 = scmp.lt.s32.totalorder %s4126_s15, %s4126_s15 }
  0x4b   : > { %p4129_p12 = pnand %p4127_p11, %p4602_p7  ;;  %p4136_p5 = por %p4135_p2, %p4134_p0 }
  0x4c   : > { %3902 = dma.hbm_to_vmem [thread:$0]  (!%p4592_p6), %s5274_s9, 512, %s4598_s21, [#allocation15], %s5228_s28, %s5228_s28, %s5231_s18  }
  0x4d   : > { %p4130_p13 = pneg %p4129_p12 }
  0x4f   : > { %p4137_p8 = pnand %p4136_p5, %p4130_p13 }
  0x51   : > { %4140 = shalt.err (!%p4137_p8)
}
  0x52   : > { %s5275_s11 = sld [smem:[#allocation45_spill]]  ;;  %s3454_s17 = sadd.s32 4294967294, %s4443_s27  }
  0x53   : > { %s4658_s20 = sadd.s32 1, %s4443_s27   ;;  %s49_s15 = sadd.s32 1, %s4439_s26 }
  0x54   : > { %5276 = sst [smem:[#allocation33_spill]] %s4658_s20  ;;  %s46_s19 = ssub.s32 %s4443_s27, %s4658_s20 }
  0x55   : > { %p47_p9 = scmp.eq.s32.totalorder %s46_s19, 0  ;;  %p56_p10 = scmp.ne.s32.totalorder %s4439_s26, %s4435_s25 }
  0x56   : > { %p57_p11 = scmp.eq.s32.totalorder %s4443_s27, 0  ;;  %p62_p12 = scmp.ne.s32.totalorder %s4435_s25, %s4431_s24 }
  0x57   : > { %s4669_s29 = scalar_select %p47_p9, %s4439_s26, %s49_s15  }
  0x58   : > { %3908 = dma.hbm_to_vmem [thread:$0]  (!%p4592_p6), %s5275_s11, 512, %s546_s23, [#allocation18], %s5228_s28, %s5228_s28, %s5231_s18  }
  0x59   : > { %5277 = sst [smem:[#allocation34_spill]] %s4669_s29  ;;  %p58_p13 = por %p57_p11, %p56_p10 }
  0x5a   : > { %p4673_p0 = por %p5242_p1, %p62_p12  ;;  %p390_p2 = scmp.eq.s32.totalorder %s4578_s0, 1 }
  0x5b   : > { %p396_p5 = scmp.eq.s32.totalorder %s3454_s17, 1  ;;  %p3938_p8 = scmp.lt.s32.totalorder %s4443_s27, 2 }
  0x5c   : > { %s5278_s21 = scalar_select %p4673_p0, 1, 0 }
  0x5d   : > { %s5233_s23 = sand.u32 1, %s4439_s26   ;;  %p4680_p4 = por %p390_p2, %p56_p10 }
  0x5e   : > { %p4684_p3 = por %p396_p5, %p62_p12  ;;  %s4690_s15 = sshll.u32 %s5233_s23, 4 }
  0x5f   : > { %s5279_s28 = scalar_select %p4680_p4, 1, 0 }
  0x60   : > { %s5281_s19 = scalar_select %p4684_p3, 1, 0 }
  0x61   : > { %5280 = sst [smem:[#allocation35_spill]] %s5279_s28  ;;  %s4693_s18 = sshll.u32 %s4443_s27, 8 }
  0x62   : > { %5282 = sst [smem:[#allocation36_spill]] %s5281_s19  ;;  %p4695_p9 = pnand %p3938_p8, %p58_p13 }
  0x63   : > { %s607_s17 = sand.u32 1, %s4443_s27   ;;  %s5284_s11 = sld [smem:[#allocation38_spill]] }
  0x64   : > { %s5283_s5 = scalar_select %p4695_p9, 1, 0 }
  0x65   : > { %s611_s23 = scalar_lea.vmem [#allocation5], %s4690_s15  ;;  %s4451_s19 = smov [#allocation10]  }
  0x66   : > { %s618_s20 = sshll.u32 %s611_s23, 4  ;;  %s4709_s24 = sshll.u32 %s4451_s19, 4  ;;  %s4707_s20 = int_to_ptr.vmem [resolvable:$true] %s618_s20  ;;  %s488_s24 = int_to_ptr.vmem [resolvable:$true] %s4709_s24 }
  0x67   : > { %s4711_s28 = scalar_lea.sflag [#allocation6], %s607_s17  ;;  %p4717_p11 = pneg %p4695_p9 }
  0x69   : > { %s4704_s29 = scalar_lea.hbm %s5284_s11, %s4693_s18  ;;  %s4146_s23 = scalar_lea.hbm %s5284_s11, 512 }
  0x6a   : > { %s4141_s14 = scalar_lea.hbm %s4704_s29, 256  ;;  %p4147_p2 = scmp.lt.s32.totalorder %s4704_s29, %s5284_s11 }
  0x6b   : > { %p4142_p10 = scmp.ne.s32.totalorder %s4704_s29, %s4141_s14  ;;  %p4148_p5 = scmp.lt.s32.totalorder %s4146_s23, %s4141_s14 }
  0x6c   : > { %s5285_s27 = scalar_select %p4717_p11, 1, 0 }
  0x6d   : > { %p4144_p12 = pnand %p4717_p11, %p4142_p10  ;;  %p4149_p8 = por %p4148_p5, %p4147_p2 }
  0x6f   : > { %p4145_p13 = pneg %p4144_p12 }
  0x71   : > { %p4150_p1 = pnand %p4149_p8, %p4145_p13 }
  0x73   : > { %4153 = shalt.err (!%p4150_p1)
}
  0x74   : > { %s4154_s17 = scalar_lea.vmem %s4707_s20, 256  ;;  %s4452_s4 = smov [#allocation5]  }
  0x75   : > { %p4155_p3 = scmp.ne.s32.totalorder %s4707_s20, %s4154_s17  ;;  %s4159_s7 = sshll.u32 %s4452_s4, 4  ;;  %s4160_s7 = int_to_ptr.vmem [resolvable:$false] %s4159_s7 }
  0x76   : > { %s4161_s9 = scalar_lea.vmem %s4160_s7, 512  ;;  %p4162_p4 = scmp.lt.s32.totalorder %s4707_s20, %s4160_s7 }
  0x77   : > { %p4157_p10 = pnand %p4155_p3, %p4717_p11  ;;  %p4163_p0 = scmp.lt.s32.totalorder %s4161_s9, %s4154_s17 }
  0x79   : > { %p4158_p12 = pneg %p4157_p10  ;;  %p4164_p6 = por %p4163_p0, %p4162_p4 }
  0x7b   : > { %p4165_p7 = pnand %p4164_p6, %p4158_p12 }
  0x7d   : > { %4168 = shalt.err (!%p4165_p7)
}
  0x7e   : > { %s5286_s14 = smov 8   ;;  %s5287_s16 = smov 128  }
  0x7f   : > { %3921 = dma.hbm_to_vmem [thread:$0]  (!%p4695_p9), %s4704_s29, 256, %s4707_s20, %s4711_s28, %s5287_s16, %s5287_s16, %s5286_s14  }
  0x80   : > { %s4180_s4 = scalar_lea.vmem %s488_s24, 16  ;;  %p5288_p3 = scmp.ne.s32.totalorder %s5271_s22, 0 }
  0x81   : > { %p4181_p1 = scmp.ne.s32.totalorder %s488_s24, %s4180_s4  ;;  %s4187_s23 = scalar_lea.vmem %s488_s24, 32 }
  0x82   : > { %p4188_p4 = scmp.lt.s32.totalorder %s488_s24, %s488_s24  ;;  %p4189_p6 = scmp.lt.s32.totalorder %s4187_s23, %s4180_s4 }
  0x83   : > { %p4183_p13 = pnand %p4181_p1, %p5288_p3 }
  0x84   : > { %p4190_p7 = por %p4189_p6, %p4188_p4 }
  0x85   : > { %p4184_p2 = pneg %p4183_p13 }
  0x87   : > { %p4191_p0 = pnand %p4190_p7, %p4184_p2 }
  0x89   : > { %4194 = shalt.err (!%p4191_p0)
}
  0x8a   : > { %p5289_p5 = scmp.ne.s32.totalorder %s5270_s1, 0  ;;  %s5290_s6 = sld [smem:[#allocation41_spill]] }
  0x8b   : > { %s4453_s20 = smov [#allocation13]   ;;  %s4454_s7 = smov [#allocation16]  }
  0x8c   : > { %s511_s29 = sshll.u32 %s4453_s20, 4  ;;  %s535_s9 = sshll.u32 %s4454_s7, 4  ;;  %s512_s29 = int_to_ptr.vmem [resolvable:$true] %s511_s29  ;;  %s536_s9 = int_to_ptr.vmem [resolvable:$true] %s535_s9 }
  0x8d   : > { %s4206_s11 = scalar_lea.vmem %s512_s29, 16  ;;  %s4213_s4 = scalar_lea.vmem %s512_s29, 32 }
  0x8e   : > { %p4207_p8 = scmp.ne.s32.totalorder %s512_s29, %s4206_s11  ;;  %p4214_p1 = scmp.lt.s32.totalorder %s512_s29, %s512_s29 }
  0x8f   : > { %p4215_p13 = scmp.lt.s32.totalorder %s4213_s4, %s4206_s11 }
  0x90   : > { %3893 = dma.hbm_to_vmem [thread:$0]  (!%p5289_p5), %s5290_s6, 16, %s488_s24, [#allocation9]  }
  0x91   : > { %p4209_p10 = pnand %p4207_p8, %p5288_p3  ;;  %p4216_p2 = por %p4215_p13, %p4214_p1 }
  0x93   : > { %p4210_p12 = pneg %p4209_p10 }
  0x95   : > { %p4217_p4 = pnand %p4216_p2, %p4210_p12 }
  0x97   : > { %4220 = shalt.err (!%p4217_p4)
}
  0x98   : > { %s5291_s8 = sld [smem:[#allocation43_spill]]  ;;  %s4232_s19 = scalar_lea.vmem %s536_s9, 16 }
  0x99   : > { %p4233_p6 = scmp.ne.s32.totalorder %s536_s9, %s4232_s19  ;;  %s4239_s17 = scalar_lea.vmem %s536_s9, 32 }
  0x9a   : > { %p4240_p8 = scmp.lt.s32.totalorder %s536_s9, %s536_s9  ;;  %p4241_p10 = scmp.lt.s32.totalorder %s4239_s17, %s4232_s19 }
  0x9b   : > { %p4235_p7 = pnand %p4233_p6, %p5288_p3 }
  0x9c   : > { %p4242_p9 = por %p4241_p10, %p4240_p8 }
  0x9d   : > { %p4236_p0 = pneg %p4235_p7 }
  0x9e   : > { %3899 = dma.hbm_to_vmem [thread:$0]  (!%p5289_p5), %s5291_s8, 16, %s512_s29, [#allocation12]  }
  0x9f   : > { %p4243_p1 = pnand %p4242_p9, %p4236_p0 }
  0xa1   : > { %4246 = shalt.err (!%p4243_p1)
}
  0xa2   : > { %3905 = dma.hbm_to_vmem [thread:$0]  (!%p5289_p5), %s5217_s10, 16, %s536_s9, [#allocation15]  }
  0xa3   : > { %s4455_s29 = smov [#allocation19]   ;;  %s4456_s4 = smov [#allocation20]  }
  0xa4   : > { %s559_s7 = sshll.u32 %s4455_s29, 4  ;;  %s569_s23 = sshll.u32 %s4456_s4, 4  ;;  %s560_s7 = int_to_ptr.vmem [resolvable:$true] %s559_s7  ;;  %s570_s23 = int_to_ptr.vmem [resolvable:$true] %s569_s23 }
  0xa5   : > { %s4258_s24 = scalar_lea.vmem %s560_s7, 16  ;;  %s4265_s19 = scalar_lea.vmem %s560_s7, 32 }
  0xa6   : > { %p4259_p12 = scmp.ne.s32.totalorder %s560_s7, %s4258_s24  ;;  %p4266_p9 = scmp.lt.s32.totalorder %s560_s7, %s560_s7 }
  0xa7   : > { %p4267_p4 = scmp.lt.s32.totalorder %s4265_s19, %s4258_s24 }
  0xa8   : > { %p4261_p13 = pnand %p4259_p12, %p5288_p3 }
  0xa9   : > { %p4268_p6 = por %p4267_p4, %p4266_p9 }
  0xaa   : > { %p4262_p2 = pneg %p4261_p13 }
  0xac   : > { %p4269_p7 = pnand %p4268_p6, %p4262_p2 }
  0xae   : > { %4272 = shalt.err (!%p4269_p7)
}
  0xaf   : > { %3911 = dma.hbm_to_vmem [thread:$0]  (!%p5289_p5), %s5219_s12, 16, %s560_s7, [#allocation18]  }
  0xb0   : > { %s4284_s11 = scalar_lea.vmem %s570_s23, 1024  ;;  %p4292_p1 = scmp.lt.s32.totalorder %s570_s23, %s570_s23 }
  0xb1   : > { %p4285_p0 = scmp.ne.s32.totalorder %s570_s23, %s4284_s11  ;;  %p4293_p12 = scmp.lt.s32.totalorder %s4284_s11, %s4284_s11 }
  0xb3   : > { %p4287_p8 = pnand %p4285_p0, %p5288_p3  ;;  %p4294_p13 = por %p4293_p12, %p4292_p1 }
  0xb5   : > { %p4288_p10 = pneg %p4287_p8 }
  0xb7   : > { %p4295_p11 = pnand %p4294_p13, %p4288_p10 }
  0xb9   : > { %4298 = shalt.err (!%p4295_p11)
}
  0xba   : > { %3914 = dma.hbm_to_vmem [thread:$0]  (!%p5289_p5), %s5220_s13, 1024, %s570_s23, [#allocation21], %s5287_s16, %s5287_s16, %s5286_s14  }
  0xbb   : > { %s5292_s4 = sld [smem:[#allocation37_spill]]  ;;  %s590_s1 = scalar_lea.vmem [#allocation2], %s4690_s15 }
  0xbc   : > { %s597_s19 = sshll.u32 %s590_s1, 4  ;;  %s4795_s11 = scalar_lea.hbm %s5209_s2, %s4693_s18  ;;  %s4789_s19 = int_to_ptr.vmem [resolvable:$true] %s597_s19 }
  0xbd   : > { %s5293_s20 = sand.u32 1, %s4439_s26   ;;  %p5294_p3 = scmp.ne.s32.totalorder %s5285_s27, 0 }
  0xbe   : > { %s587_s29 = scalar_lea.sflag [#allocation3], %s5293_s20 }
  0xc1   : > { %s4786_s24 = scalar_lea.hbm %s5292_s4, %s4693_s18  ;;  %s4304_s6 = scalar_lea.hbm %s5292_s4, 512 }
  0xc2   : > { %s4299_s23 = scalar_lea.hbm %s4786_s24, 256  ;;  %p4305_p9 = scmp.lt.s32.totalorder %s4786_s24, %s5292_s4 }
  0xc3   : > { %p4300_p11 = scmp.ne.s32.totalorder %s4786_s24, %s4299_s23  ;;  %p4306_p4 = scmp.lt.s32.totalorder %s4304_s6, %s4299_s23 }
  0xc5   : > { %p4302_p5 = pnand %p4300_p11, %p5294_p3  ;;  %p4307_p6 = por %p4306_p4, %p4305_p9 }
  0xc7   : > { %p4303_p2 = pneg %p4302_p5 }
  0xc9   : > { %p4308_p7 = pnand %p4307_p6, %p4303_p2 }
  0xcb   : > { %4311 = shalt.err (!%p4308_p7)
}
  0xcc   : > { %s4312_s18 = scalar_lea.vmem %s4789_s19, 256  ;;  %s4457_s17 = smov [#allocation2]  }
  0xcd   : > { %p4313_p0 = scmp.ne.s32.totalorder %s4789_s19, %s4312_s18  ;;  %s4317_s9 = sshll.u32 %s4457_s17, 4  ;;  %s4318_s9 = int_to_ptr.vmem [resolvable:$false] %s4317_s9 }
  0xce   : > { %s4319_s20 = scalar_lea.vmem %s4318_s9, 512  ;;  %p4320_p1 = scmp.lt.s32.totalorder %s4789_s19, %s4318_s9 }
  0xcf   : > { %p4315_p8 = pnand %p4313_p0, %p5294_p3  ;;  %p4321_p12 = scmp.lt.s32.totalorder %s4319_s20, %s4312_s18 }
  0xd1   : > { %p4316_p10 = pneg %p4315_p8  ;;  %p4322_p13 = por %p4321_p12, %p4320_p1 }
  0xd3   : > { %p4323_p11 = pnand %p4322_p13, %p4316_p10 }
  0xd5   : > { %4326 = shalt.err (!%p4323_p11)
}
  0xd6   : > { %p5295_p5 = scmp.ne.s32.totalorder %s5283_s5, 0  ;;  %s632_s6 = scalar_lea.vmem [#allocation7], %s4690_s15 }
  0xd7   : > { %s639_s8 = sshll.u32 %s632_s6, 4  ;;  %s4327_s23 = scalar_lea.hbm %s4795_s11, 256  ;;  %s640_s8 = int_to_ptr.vmem [resolvable:$true] %s639_s8 }
  0xd8   : > { %3918 = dma.hbm_to_vmem [thread:$0]  (!%p5295_p5), %s4786_s24, 256, %s4789_s19, %s587_s29, %s5287_s16, %s5287_s16, %s5286_s14  }
  0xd9   : > { %p4328_p2 = scmp.ne.s32.totalorder %s4795_s11, %s4327_s23  ;;  %s4332_s1 = scalar_lea.hbm %s5209_s2, 512 }
  0xda   : > { %p4333_p6 = scmp.lt.s32.totalorder %s4795_s11, %s5209_s2  ;;  %p4334_p7 = scmp.lt.s32.totalorder %s4332_s1, %s4327_s23 }
  0xdb   : > { %p4330_p9 = pnand %p4328_p2, %p5294_p3 }
  0xdc   : > { %p4335_p0 = por %p4334_p7, %p4333_p6 }
  0xdd   : > { %p4331_p4 = pneg %p4330_p9 }
  0xdf   : > { %p4336_p8 = pnand %p4335_p0, %p4331_p4 }
  0xe1   : > { %4339 = shalt.err (!%p4336_p8)
}
  0xe2   : > { %s4340_s15 = scalar_lea.vmem %s640_s8, 256  ;;  %s4458_s24 = smov [#allocation7]  }
  0xe3   : > { %p4341_p10 = scmp.ne.s32.totalorder %s640_s8, %s4340_s15  ;;  %s4345_s19 = sshll.u32 %s4458_s24, 4  ;;  %s4346_s19 = int_to_ptr.vmem [resolvable:$false] %s4345_s19 }
  0xe4   : > { %s4347_s29 = scalar_lea.vmem %s4346_s19, 512  ;;  %p4348_p13 = scmp.lt.s32.totalorder %s640_s8, %s4346_s19 }
  0xe5   : > { %p4343_p1 = pnand %p4341_p10, %p5294_p3  ;;  %p4349_p11 = scmp.lt.s32.totalorder %s4347_s29, %s4340_s15 }
  0xe7   : > { %p4344_p12 = pneg %p4343_p1  ;;  %p4350_p2 = por %p4349_p11, %p4348_p13 }
  0xe9   : > { %p4351_p9 = pnand %p4350_p2, %p4344_p12 }
  0xeb   : > { %4354 = shalt.err (!%p4351_p9)
}
  0xec   : > { %3924 = dma.hbm_to_vmem [thread:$0]  (!%p5295_p5), %s4795_s11, 256, %s640_s8, %s4711_s28, %s5287_s16, %s5287_s16, %s5286_s14  }
  0xed   : > { %p5296_p3 = scmp.ne.s32.totalorder %s5269_s30, 0 }
  0xee   : > { %s4846_s27 = sand.u32 (!%p5296_p3), 1, %s4435_s25   ;;  %p5297_p4 = scmp.ne.s32.totalorder (!%p5296_p3), %s5278_s21, 0 }
  0xef   : > { %651 = sbr.rel (%p5296_p3) target bundleno = 3928 (0xf58), region = 80  ;;  %s4849_s9 = sshll.u32 (!%p5296_p3), %s4846_s27, 4 }
  0xf0   : > { %s654_s20 = scalar_lea.sflag (!%p5296_p3), [#allocation3], %s4846_s27  ;;  %s657_s5 = scalar_lea.vmem (!%p5296_p3), [#allocation2], %s4849_s9 }
  0xf4   : > { %4398 = dma.done.wait (%p5297_p4), %s654_s20, 256  }
  0xf5   : > { %4400 = vsyncadd (%p5297_p4), %s654_s20, 4294967040  ;;  %s662_s30 = sand.u32 1, %s4578_s0   ;;  %s666_s14 = scalar_lea.vmem [#allocation5], %s4849_s9 }
  0xf6   : > { %s663_s28 = scalar_lea.sflag [#allocation6], %s662_s30 }
  0xf7   : > { %4402 = dma.done.wait (%p5297_p4), %s663_s28, 512  }
  0xf8   : > { %4404 = vsyncadd (%p5297_p4), %s663_s28, 4294966784  ;;  %s675_s16 = scalar_lea.vmem [#allocation7], %s4849_s9  ;;  %p5298_p5 = scmp.eq.s32.totalorder %s4578_s0, 0 }
  0xfa   : > { %4406 = dma.done.wait (%p5298_p5), [#allocation9], 528   ;;  %p5299_p6 = pmov %p5298_p5 }
  0xfb   : > { %p5300_p7 = pmov %p5298_p5 }
  0xfc   : > { %4408 = vsyncadd (%p5299_p6), [#allocation9], 4294966768 }
  0xfd   : > { %4410 = dma.done.wait (%p5300_p7), [#allocation12], 528   ;;  %p5301_p0 = pmov %p5298_p5 }
  0xff   : > { %4412 = vsyncadd (%p5301_p0), [#allocation12], 4294966768  ;;  %p5302_p8 = pmov %p5301_p0 }
 0x100   : > { %p5303_p10 = pmov %p5301_p0 }
 0x101   : > { %4414 = dma.done.wait (%p5302_p8), [#allocation15], 528  }
 0x102   : > { %4416 = vsyncadd (%p5303_p10), [#allocation15], 4294966768  ;;  %p5304_p1 = pmov %p5301_p0 }
 0x103   : > { %p5305_p12 = pmov %p5301_p0 }
 0x104   : > { %4418 = dma.done.wait (%p5304_p1), [#allocation18], 528  }
 0x105   : > { %4420 = vsyncadd (%p5305_p12), [#allocation18], 4294966768  ;;  %p5306_p13 = pmov %p5301_p0 }
 0x106   : > { %p5307_p11 = pmov %p5301_p0 }
 0x107   : > { %4422 = dma.done.wait (%p5306_p13), [#allocation21], 1024  }
 0x108   : > { %4424 = vsyncadd (%p5307_p11), [#allocation21], 4294966272  ;;  %vm809_vm0 = vcmask 261120   ;;  %v801_v0 = vld [vmem:[%s5210_s3 + $0x18] sm:$0xff]  ;;  %v800_v1 = vld [vmem:[%s5210_s3 + $0x10] sm:$0xff]  ;;  %v4459_v11 = vmov 0.0  }
 0x109   : > { %3669 = vmatprep.subr.mxu0 %v801_v0  ;;  %v4890_v2 = vld [vmem:[%s675_s16] sm:$0xff]  ;;  %v799_v3 = vld [vmem:[%s5210_s3 + $0x8] sm:$0xff]  ;;  %v1100_v6 = vld [vmem:[#allocation8 + $0x18] sm:$0xff]  ;;  %3680 = vmatprep.subr.mxu1 %v4459_v11  ;;  %vm4460_vm1 = vmmov 0   ;;  %p782_p2 = scmp.lt.s32.totalorder %s4578_s0, 1  ;;  %s5308_s19 = sld [smem:[#allocation39_spill]] }
 0x10a   : > { %3670 = vmatpush3.msra.mxu0 %v801_v0  ;;  %3677 = vmatprep.mubr.msk.f32.mxu0 %vm809_vm0, %v4890_v2  ;;  %v798_v4 = vld [vmem:[%s5210_s3] sm:$0xff]  ;;  %v4900_v5 = vld [vmem:[%s675_s16 + $0x8] sm:$0xff]  ;;  %v1099_v7 = vld [vmem:[#allocation8 + $0x10] sm:$0xff]  ;;  %vm891_vm2 = vcmask 64512   ;;  %vm953_vm3 = vcmask 130048   ;;  %s5310_s16 = sld [smem:[#allocation46_spill]] }
 0x10b   : > { %3671 = vmatprep.subr.mxu0 %v800_v1  ;;  %v1098_v8 = vld [vmem:[#allocation8 + $0x8] sm:$0xff]  ;;  %v1097_v9 = vld [vmem:[#allocation8] sm:$0xff]  ;;  %v1275_v14 = vld [vmem:[#allocation14 + $0x10] sm:$0xff]  ;;  %3684 = vmatprep.mubr.msk.f32.mxu1 %vm4460_vm1, %v4459_v11  ;;  %s4924_s18 = scalar_select %p782_p2, %s4578_s0, 1 }
 0x10c   : > { %3672 = vmatpush3.msra.mxu0 %v800_v1  ;;  %v792_v10 = vld [vmem:[%s657_s5] sm:$0xff]  ;;  %v793_v12 = vld [vmem:[%s657_s5 + $0x8] sm:$0xff]  ;;  %s5309_s5 = sld [smem:[#allocation48_spill]]  ;;  %s4461_s1 = smov 120  }
 0x10d   : > { %3673 = vmatprep.subr.mxu0 %v799_v3  ;;  %v1276_v13 = vld [vmem:[#allocation14 + $0x18] sm:$0xff]  ;;  %v1274_v15 = vld [vmem:[#allocation14 + $0x8] sm:$0xff]  ;;  %v1273_v16 = vld [vmem:[#allocation14] sm:$0xff]  ;;  %s3570_s17 = sshll.u32 %s4924_s18, 4  ;;  %s3571_s6 = sshll.u32 %s4924_s18, 6 }
 0x10e   : > { %3674 = vmatpush3.msra.mxu0 %v799_v3  ;;  %v795_v17 = vld [vmem:[%s666_s14 + $0x8] sm:$0xff]  ;;  %v794_v47 = vld [vmem:[%s666_s14] sm:$0xff]  ;;  %s5311_s22 = sld [smem:[#allocation49_spill]]  ;;  %s4463_s28 = smov 104  }
 0x10f   : > { %3675 = vmatprep.subr.mxu0 %v798_v4  ;;  %3681 = vmatpush3.msra.mxu1 %v795_v17  ;;  %v3493_v18 = vld [vmem:[%s5308_s19] ss:$0 sm:$0xff]  ;;  %v1191_v53 = vld [vmem:[#allocation11 + $0x10] sm:$0xff]  ;;  %v1190_v54 = vld [vmem:[#allocation11 + $0x8] sm:$0xff]  ;;  %s4462_s19 = smov 112   ;;  %s5312_s8 = sld [smem:[#allocation35_spill]] }
 0x110   : > { %3676 = vmatpush3.msra.mxu0 %v798_v4  ;;  %3682 = vmatprep.subr.mxu1 %v4459_v11  ;;  %v1192_v52 = vld [vmem:[#allocation11 + $0x18] sm:$0xff]  ;;  %v1189_v55 = vld [vmem:[#allocation11] sm:$0xff]  ;;  %s3572_s23 = sshll.u32 %s4578_s0, 8  ;;  %s3173_s0 = scalar_lea.sflag [#allocation4], %s4846_s27 }
 0x111   : > { %3678 = vmatmul.mubr.msk.f32.vlgmr.msra.gmra.mxu0 %vm809_vm0, %v4900_v5  ;;  %3694 = vmatprep.subr.mxu0 %v1100_v6  ;;  %v3498_v61 = vld [vmem:[#allocation10] ss:$0 sm:$0xff]  ;;  %v1531_v1 = vld [vmem:[%s5310_s16 + $0x8] sm:$0xff]  ;;  %s4464_s24 = smov [#allocation22]  }
 0x112   : > { %3695 = vmatpush3.msra.mxu0 %v1100_v6  ;;  %3702 = vmatprep.mubr.msk.f32.mxu0 %vm809_vm0, %v792_v10  ;;  %s786_s30 = scalar_lea.vmem %s5309_s5, %s3570_s17  ;;  %v1530_v0 = vld [vmem:[%s5310_s16] sm:$0xff]  ;;  %s5313_s17 = sld [smem:[#allocation47_spill]] }
 0x113   : > { %3696 = vmatprep.subr.mxu0 %v1099_v7  ;;  %3683 = vmatpush3.msra.mxu1 %v794_v47 }
 0x114   : > { %3697 = vmatpush3.msra.mxu0 %v1099_v7  ;;  %3687 = vmatprep.subr.mxu1 %v4459_v11  ;;  %s5004_s7 = scalar_lea.vmem %s5311_s22, %s3571_s6  ;;  %s767_s22 = scalar_lea.vmem [#allocation22], %s4849_s9 }
 0x115   : > { %3698 = vmatprep.subr.mxu0 %v1098_v8  ;;  %p5314_p3 = scmp.ne.s32.totalorder %s5312_s8, 0 }
 0x116   : > { %3699 = vmatpush3.msra.mxu0 %v1098_v8  ;;  %v1447_v8 = vld [vmem:[#allocation20] sm:$0xff] }
 0x117   : > { %3700 = vmatprep.subr.mxu0 %v1097_v9 }
 0x118   : > { %3701 = vmatpush3.msra.mxu0 %v1097_v9  ;;  %v3503_v9 = vld [vmem:[#allocation16] ss:$0 sm:$0xff]  ;;  %s5160_s15 = scalar_lea.hbm %s5313_s17, %s3572_s23 }
 0x119   : > { %3716 = vmatprep.subr.mxu0 %v4459_v11  ;;  %3703 = vmatmul.mubr.msk.f32.vlgmr.msra.gmra.mxu0 %vm809_vm0, %v793_v12 }
 0x11a   : > { %3717 = vmatpush3.msra.mxu0 %v1276_v13  ;;  %3724 = vmatprep.mubr.msk.f32.mxu0 %vm4460_vm1, %v4459_v11 }
 0x11b   : > { %3718 = vmatprep.subr.mxu0 %v4459_v11 }
 0x11c   : > { %3719 = vmatpush3.msra.mxu0 %v1275_v14 }
 0x11d   : > { %3720 = vmatprep.subr.mxu0 %v4459_v11 }
 0x11e   : > { %3721 = vmatpush3.msra.mxu0 %v1274_v15 }
 0x11f   : > { %3722 = vmatprep.subr.mxu0 %v4459_v11 }
 0x120   : > { %3723 = vmatpush3.msra.mxu0 %v1273_v16 }
 0x1d1   : > { %v3679_v19 = vpop.f32.mrf.mxu0 }
 0x1d2   : > { %v888_v20 = vadd.f32 %v3679_v19, %v3493_v18 }
 0x1d3   : > { %v882_v21 = vpop.f32.mrf.mxu0 }
 0x1d4   : > { %893 = vst.msk [vmem:[%s786_s30 + $0x8] sm:$0xff] %vm891_vm2, %v888_v20  ;;  %v883_v22 = vadd.f32 %v3493_v18, %v882_v21  ;;  %v895_v23 = vsel %vm891_vm2, %v888_v20, -inf }
 0x1d6   : > { %892 = vst.msk [vmem:[%s786_s30] sm:$0xff] %vm891_vm2, %v883_v22  ;;  %v894_v24 = vsel %vm891_vm2, %v883_v22, -inf }
 0x1d7   : > { %v896_v25 = vmax.f32 %v894_v24, %v895_v23 }
 0x1d9   : > { %v897_v26 = vrot.slane %v896_v25, 4  ;;  %v3704_v60 = vpop.f32.mrf.mxu0 }
 0x1da   : > { %v4985_v7 = vadd.f32 %v3704_v60, %v3498_v61 }
 0x1db   : > { %v898_v27 = vmax.f32 %v896_v25, %v897_v26  ;;  %v1180_v62 = vpop.f32.mrf.mxu0 }
 0x1dc   : > { %v4967_v63 = vadd.f32 %v3498_v61, %v1180_v62 }
 0x1dd   : > { %v899_v28 = vrot.slane %v898_v27, 2 }
 0x1df   : > { %v900_v29 = vmax.f32 %v898_v27, %v899_v28 }
 0x1e1   : > { %v901_v30 = vrot.slane %v900_v29, 1 }
 0x1e3   : > { %v902_v31 = vmax.f32 %v900_v29, %v901_v30 }
 0x1e5   : > { %v903_v32 = vsub.f32 %v883_v22, %v902_v31  ;;  %v904_v33 = vsub.f32 %v888_v20, %v902_v31 }
 0x1e7   : > { %v905_v34 = vmul.f32 1.442695, %v903_v32  ;;  %v907_v35 = vmul.f32 1.442695, %v904_v33 }
 0x1e9   : > { %3999 = vpow2.f32 %v905_v34 }
 0x1ea   : > { %4001 = vpow2.f32 %v907_v35 }
 0x1f6   : > { %v4000_v36 = vpop.eup %3999 }
 0x1f7   : > { %v4002_v37 = vpop.eup %4001  ;;  %v909_v38 = vsel %vm891_vm2, %v4000_v36, 0.0 }
 0x1f8   : > { %v910_v39 = vsel %vm891_vm2, %v4002_v37, 0.0 }
 0x1f9   : > { %v911_v40 = vadd.f32 %v910_v39, %v909_v38 }
 0x1fb   : > { %v912_v41 = vrot.slane %v911_v40, 4 }
 0x1fd   : > { %v913_v42 = vadd.f32 %v912_v41, %v911_v40 }
 0x1ff   : > { %v914_v43 = vrot.slane %v913_v42, 2 }
 0x201   : > { %v915_v44 = vadd.f32 %v914_v43, %v913_v42  ;;  %v3519_v43 = vld [vmem:[%s5310_s16 + $0x10] sm:$0xff] }
 0x203   : > { %v916_v45 = vrot.slane %v915_v44, 1 }
 0x205   : > { %v917_v46 = vadd.f32 %v916_v45, %v915_v44 }
 0x207   : > { %4003 = vrcp.f32 %v917_v46  ;;  %v3520_v46 = vld [vmem:[%s5310_s16 + $0x18] sm:$0xff] }
 0x214   : > { %v4004_v48 = vpop.eup %4003 }
 0x215   : > { %v4942_v49 = vmul.f32 %v4004_v48, %v4000_v36  ;;  %v4944_v50 = vmul.f32 %v4004_v48, %v4002_v37  ;;  %v1812_v48 = vld [vmem:[#allocation20 + $0x10] sm:$0xff] }
 0x217   : > { %921 = vxpose.xlu0.b32.start [1/2] (short) (narrow) %v4942_v49, 8  ;;  %3739 = vmatprep.subr.mxu0 %v4944_v50 }
 0x21b   : > { %922 = vxpose.xlu0.b32.end [2/2] (short) (narrow) %v4944_v50, 8 }
 0x293   : > { %v937_v51 = vpop.trf.xlu0 }
 0x294   : > { %3685 = vmatmul.mubr.msk.f32.vlgmr.msra.gmra.mxu1 %vm953_vm3, %v937_v51 }
 0x295   : > { %3688 = vmatpush3.msra.mxu1 %v4900_v5  ;;  %3691 = vmatprep.mubr.msk.f32.mxu1 %vm4460_vm1, %v4459_v11 }
 0x296   : > { %3689 = vmatprep.subr.mxu1 %v4459_v11 }
 0x297   : > { %3690 = vmatpush3.msra.mxu1 %v4890_v2  ;;  %v3501_v2 = vld [vmem:[#allocation13] ss:$0 sm:$0xff] }
 0x298   : > { %3692 = vmatmul.mubr.msk.f32.vlgmr.msra.gmra.mxu1 %vm953_vm3, %v937_v51  ;;  %3705 = vmatprep.subr.mxu1 %v4459_v11  ;;  %v1813_v51 = vld [vmem:[#allocation20 + $0x18] sm:$0xff] }
 0x299   : > { %3706 = vmatpush3.msra.mxu1 %v1192_v52  ;;  %3713 = vmatprep.mubr.msk.f32.mxu1 %vm4460_vm1, %v4459_v11 }
 0x29a   : > { %3707 = vmatprep.subr.mxu1 %v4459_v11 }
 0x29b   : > { %3708 = vmatpush3.msra.mxu1 %v1191_v53 }
 0x29c   : > { %3709 = vmatprep.subr.mxu1 %v4459_v11 }
 0x29d   : > { %3710 = vmatpush3.msra.mxu1 %v1190_v54 }
 0x29e   : > { %3711 = vmatprep.subr.mxu1 %v4459_v11  ;;  %v1448_v11 = vld [vmem:[#allocation20 + $0x8] sm:$0xff] }
 0x29f   : > { %3712 = vmatpush3.msra.mxu1 %v1189_v55 }
 0x354   : > { %v1023_v56 = vpop.f32.mrf.mxu1 }
 0x355   : > { %3714 = vmatmul.mubr.msk.f32.vlgmr.msra.gmra.mxu1 %vm809_vm0, %v1023_v56 }
 0x356   : > { %v3686_v57 = vpop.f32.mrf.mxu1  ;;  %3729 = vmatprep.mubr.msk.f32.mxu1 %vm891_vm2, %v4967_v63 }
 0x358   : > { %v1093_v58 = vpop.f32.mrf.mxu1 }
 0x359   : > { %3725 = vmatmul.mubr.msk.f32.vlgmr.msra.gmra.mxu0 %vm809_vm0, %v1093_v58 }
 0x35a   : > { %3740 = vmatpush3.msra.mxu0 %v4944_v50  ;;  %v3693_v59 = vpop.f32.mrf.mxu1  ;;  %3743 = vmatprep.mubr.msk.f32.mxu0 %vm953_vm3, %v1530_v0 }
 0x35b   : > { %3741 = vmatprep.subr.mxu0 %v4942_v49 }
 0x35c   : > { %3742 = vmatpush3.msra.mxu0 %v4942_v49 }
 0x35d   : > { %3744 = vmatmul.mubr.msk.f32.vlgmr.msra.gmra.mxu0 %vm953_vm3, %v1531_v1 }
 0x415   : > { %v1269_v3 = vpop.f32.mrf.mxu1 }
 0x416   : > { %v4979_v4 = vadd.f32 %v3501_v2, %v1269_v3 }
 0x417   : > { %v3715_v5 = vpop.f32.mrf.mxu1 }
 0x418   : > { %3727 = vmatprep.subr.msk.mxu1 %vm891_vm2, %v4979_v4 }
 0x419   : > { %v1353_v6 = vpop.f32.mrf.mxu0  ;;  %3728 = vmatpush3.xpose.msk.msra.mxu1 %vm891_vm2, %v4979_v4 }
 0x41a   : > { %3732 = vmatprep.subr.mxu1 %v4944_v50  ;;  %v4992_v12 = vadd.f32 %v3503_v9, %v1353_v6  ;;  %v1358_v6 = vld [vmem:[#allocation17 + $0x8] sm:$0xff] }
 0x41b   : > { %v3726_v10 = vpop.f32.mrf.mxu0 }
 0x41c   : > { %3730 = vmatmul.mubr.msk.f32.vlgmr.msra.gmra.mxu1 %vm891_vm2, %v4985_v7 }
 0x41d   : > { %3733 = vmatpush3.msra.mxu1 %v4944_v50  ;;  %3736 = vmatprep.mubr.msk.f32.mxu1 %vm953_vm3, %v1447_v8  ;;  %v3745_v17 = vpop.f32.mrf.mxu0 }
 0x41e   : > { %3734 = vmatprep.subr.mxu1 %v4942_v49 }
 0x41f   : > { %3735 = vmatpush3.msra.mxu1 %v4942_v49  ;;  %v1604_v23 = vpop.f32.mrf.mxu0 }
 0x420   : > { %3737 = vmatmul.mubr.msk.f32.vlgmr.msra.gmra.mxu1 %vm953_vm3, %v1448_v11  ;;  %3746 = vmatprep.subr.mxu1 %v4992_v12 }
 0x421   : > { %3747 = vmatpush3.msra.mxu1 %v4992_v12 }
 0x422   : > { %3756 = vmatprep.subr.mxu1 %v4944_v50 }
 0x4dc   : > { %v3731_v13 = vpop.f32.mrf.mxu1 }
 0x4dd   : > { %v1446_v15 = vmul.f32 0.35355338, %v3731_v13 }
 0x4de   : > { %v1436_v14 = vpop.f32.mrf.mxu1 }
 0x4df   : > { %v1445_v18 = vmul.f32 0.35355338, %v1436_v14 }
 0x4e0   : > { %v3738_v16 = vpop.f32.mrf.mxu1 }
 0x4e1   : > { %v1614_v19 = vmul.f32 %v3738_v16, %v1446_v15 }
 0x4e2   : > { %v1521_v20 = vpop.f32.mrf.mxu1 }
 0x4e3   : > { %v1616_v21 = vadd.f32 %v3745_v17, %v1614_v19  ;;  %v1613_v22 = vmul.f32 %v1521_v20, %v1445_v18 }
 0x4e5   : > { %1618 = vst.msk [vmem:[%s5004_s7 + $0x8] sm:$0xff] %vm891_vm2, %v1616_v21  ;;  %v1615_v24 = vadd.f32 %v1613_v22, %v1604_v23  ;;  %v1622_v26 = vsel %vm891_vm2, %v1616_v21, -inf  ;;  %v1357_v23 = vld [vmem:[#allocation17] sm:$0xff] }
 0x4e7   : > { %1617 = vst.msk [vmem:[%s5004_s7] sm:$0xff] %vm891_vm2, %v1615_v24  ;;  %v1619_v25 = vsel %vm891_vm2, %v1615_v24, -inf }
 0x4e8   : > { %1620 = vmax.xlane.f32.xlu1 %v1619_v25 }
 0x4ec   : > { %1623 = vmax.xlane.f32.xlu1 %v1622_v26 }
 0x571   : > { %v1621_v27 = vpop.xlane.xlu1 %1620 }
 0x572   : > { %v1625_v28 = vsub.f32 %v1615_v24, %v1621_v27 }
 0x574   : > { %v1627_v29 = vmul.f32 1.442695, %v1625_v28  ;;  %v2345_v28 = vld [vmem:[#allocation20 + $0x20] sm:$0xff] }
 0x575   : > { %v1624_v30 = vpop.xlane.xlu1 %1623 }
 0x576   : > { %4005 = vpow2.f32 %v1627_v29  ;;  %v1626_v31 = vsub.f32 %v1616_v21, %v1624_v30  ;;  %v2346_v29 = vld [vmem:[#allocation20 + $0x28] sm:$0xff] }
 0x578   : > { %v1629_v32 = vmul.f32 1.442695, %v1626_v31 }
 0x57a   : > { %4007 = vpow2.f32 %v1629_v32 }
 0x583   : > { %v4006_v33 = vpop.eup %4005 }
 0x584   : > { %v1631_v34 = vsel %vm891_vm2, %v4006_v33, 0.0 }
 0x585   : > { %1632 = vadd.xlane.f32.xlu0 %v1631_v34 }
 0x587   : > { %v4008_v35 = vpop.eup %4007 }
 0x588   : > { %v1634_v36 = vsel %vm891_vm2, %v4008_v35, 0.0 }
 0x589   : > { %1635 = vadd.xlane.f32.xlu1 %v1634_v36  ;;  %v3537_v36 = vld [vmem:[%s5310_s16 + $0x28] sm:$0xff] }
 0x59a   : > { %1726 = vrot.lane.b32.xlu1 %v4979_v4, %s4461_s1 }
 0x59e   : > { %1722 = vrot.lane.b32.xlu1 %v4967_v63, %s4461_s1 }
 0x5a2   : > { %1724 = vrot.lane.b32.xlu1 %v4985_v7, %s4461_s1 }
 0x60e   : > { %v1633_v37 = vpop.xlane.xlu0 %1632 }
 0x60f   : > { %4009 = vrcp.f32 %v1633_v37 }
 0x612   : > { %v1636_v38 = vpop.xlane.xlu1 %1635 }
 0x613   : > { %4011 = vrcp.f32 %v1636_v38 }
 0x616   : > { %v1727_v39 = vpop.permute.xlu1 %1726 }
 0x617   : > { %3751 = vmatprep.subr.msk.mxu0 %vm891_vm2, %v1727_v39 }
 0x618   : > { %3752 = vmatpush3.xpose.msk.msra.mxu0 %vm891_vm2, %v1727_v39 }
 0x619   : > { %3763 = vmatprep.subr.mxu0 %v4944_v50 }
 0x61a   : > { %v1723_v40 = vpop.permute.xlu1 %1722 }
 0x61b   : > { %3753 = vmatprep.mubr.msk.f32.mxu0 %vm891_vm2, %v1723_v40 }
 0x61c   : > { %v4010_v41 = vpop.eup %4009 }
 0x61d   : > { %v1638_v42 = vmul.f32 %v4010_v41, %v4006_v33  ;;  %v3536_v33 = vld [vmem:[%s5310_s16 + $0x20] sm:$0xff] }
 0x61e   : > { %v1725_v44 = vpop.permute.xlu1 %1724 }
 0x61f   : > { %3748 = vmatprep.mubr.msk.f32.mxu1 %vm891_vm2, %v1638_v42  ;;  %3754 = vmatmul.mubr.msk.f32.vlgmr.msra.gmra.mxu0 %vm891_vm2, %v1725_v44 }
 0x620   : > { %v4012_v45 = vpop.eup %4011  ;;  %3764 = vmatpush3.msra.mxu0 %v4944_v50  ;;  %3767 = vmatprep.mubr.msk.f32.mxu0 %vm953_vm3, %v3519_v43 }
 0x621   : > { %3765 = vmatprep.subr.mxu0 %v4942_v49  ;;  %v1640_v47 = vmul.f32 %v4012_v45, %v4008_v35  ;;  %v1359_v35 = vld [vmem:[#allocation17 + $0x10] sm:$0xff] }
 0x622   : > { %3766 = vmatpush3.msra.mxu0 %v4942_v49 }
 0x623   : > { %3749 = vmatmul.mubr.msk.f32.vlgmr.msra.gmra.mxu1 %vm891_vm2, %v1640_v47  ;;  %3768 = vmatmul.mubr.msk.f32.vlgmr.msra.gmra.mxu0 %vm953_vm3, %v3520_v46 }
 0x624   : > { %3757 = vmatpush3.msra.mxu1 %v4944_v50  ;;  %3760 = vmatprep.mubr.msk.f32.mxu1 %vm953_vm3, %v1812_v48 }
 0x625   : > { %3758 = vmatprep.subr.mxu1 %v4942_v49  ;;  %3775 = vmatprep.subr.mxu0 %v1358_v6 }
 0x626   : > { %3759 = vmatpush3.msra.mxu1 %v4942_v49  ;;  %3776 = vmatpush3.msra.mxu0 %v1358_v6 }
 0x627   : > { %3761 = vmatmul.mubr.msk.f32.vlgmr.msra.gmra.mxu1 %vm953_vm3, %v1813_v51 }
 0x6df   : > { %v3755_v52 = vpop.f32.mrf.mxu0 }
 0x6e0   : > { %v1810_v56 = vmul.f32 0.35355338, %v3755_v52 }
 0x6e1   : > { %v1800_v54 = vpop.f32.mrf.mxu0 }
 0x6e2   : > { %v1809_v59 = vmul.f32 0.35355338, %v1800_v54 }
 0x6e3   : > { %v3750_v53 = vpop.f32.mrf.mxu1  ;;  %v3769_v58 = vpop.f32.mrf.mxu0 }
 0x6e5   : > { %v1713_v55 = vpop.f32.mrf.mxu1  ;;  %v1970_v1 = vpop.f32.mrf.mxu0 }
 0x6e7   : > { %v3762_v57 = vpop.f32.mrf.mxu1 }
 0x6e8   : > { %v1980_v60 = vmul.f32 %v3762_v57, %v1810_v56 }
 0x6e9   : > { %v1886_v61 = vpop.f32.mrf.mxu1 }
 0x6ea   : > { %v1982_v62 = vadd.f32 %v3769_v58, %v1980_v60  ;;  %v1979_v0 = vmul.f32 %v1886_v61, %v1809_v59 }
 0x6ec   : > { %3524 = vst.msk [vmem:[%s5004_s7 + $0x18] sm:$0xff] %vm891_vm2, %v1982_v62  ;;  %v1981_v2 = vadd.f32 %v1979_v0, %v1970_v1  ;;  %v1989_v3 = vsel %vm891_vm2, %v1982_v62, -inf }
 0x6ed   : > { %1990 = vmax.xlane.f32.xlu0 %v1989_v3 }
 0x6ee   : > { %3523 = vst.msk [vmem:[%s5004_s7 + $0x10] sm:$0xff] %vm891_vm2, %v1981_v2  ;;  %v1986_v5 = vsel %vm891_vm2, %v1981_v2, -inf }
 0x6ef   : > { %1987 = vmax.xlane.f32.xlu1 %v1986_v5 }
 0x700   : > { %2259 = vrot.lane.b32.xlu1 %v4979_v4, %s4462_s19 }
 0x704   : > { %2257 = vrot.lane.b32.xlu1 %v4985_v7, %s4462_s19 }
 0x776   : > { %v1991_v8 = vpop.xlane.xlu0 %1990 }
 0x777   : > { %v1993_v9 = vsub.f32 %v1982_v62, %v1991_v8 }
 0x778   : > { %v1988_v10 = vpop.xlane.xlu1 %1987 }
 0x779   : > { %v1996_v11 = vmul.f32 1.442695, %v1993_v9  ;;  %v1992_v13 = vsub.f32 %v1981_v2, %v1988_v10 }
 0x77b   : > { %4013 = vpow2.f32 %v1996_v11  ;;  %v1994_v14 = vmul.f32 1.442695, %v1992_v13 }
 0x77c   : > { %v2260_v15 = vpop.permute.xlu1 %2259 }
 0x77d   : > { %4015 = vpow2.f32 %v1994_v14  ;;  %3785 = vmatprep.subr.msk.mxu0 %vm891_vm2, %v2260_v15  ;;  %v3551_v14 = vld [vmem:[%s5310_s16 + $0x30] sm:$0xff] }
 0x780   : > { %v2258_v34 = vpop.permute.xlu1 %2257 }
 0x788   : > { %v4014_v16 = vpop.eup %4013 }
 0x789   : > { %v2001_v17 = vsel %vm891_vm2, %v4014_v16, 0.0 }
 0x78a   : > { %v4016_v18 = vpop.eup %4015  ;;  %2002 = vadd.xlane.f32.xlu0 %v2001_v17 }
 0x78b   : > { %v1998_v19 = vsel %vm891_vm2, %v4016_v18, 0.0 }
 0x78e   : > { %1999 = vadd.xlane.f32.xlu0 %v1998_v19  ;;  %v2799_v19 = vld [vmem:[#allocation20 + $0x38] sm:$0xff] }
 0x7a4   : > { %2009 = vrot.lane.b32.xlu0 %v4992_v12, %s4461_s1 }
 0x7a8   : > { %2255 = vrot.lane.b32.xlu0 %v4967_v63, %s4462_s19 }
 0x813   : > { %v2003_v20 = vpop.xlane.xlu0 %2002 }
 0x814   : > { %4017 = vrcp.f32 %v2003_v20 }
 0x817   : > { %v2000_v21 = vpop.xlane.xlu0 %1999 }
 0x818   : > { %4019 = vrcp.f32 %v2000_v21 }
 0x81b   : > { %v2010_v22 = vpop.permute.xlu0 %2009 }
 0x81c   : > { %3770 = vmatprep.subr.mxu1 %v2010_v22 }
 0x81d   : > { %3771 = vmatpush3.msra.mxu1 %v2010_v22 }
 0x81e   : > { %3780 = vmatprep.subr.mxu1 %v1357_v23 }
 0x81f   : > { %v2256_v32 = vpop.permute.xlu0 %2255 }
 0x821   : > { %v4018_v24 = vpop.eup %4017 }
 0x822   : > { %v2007_v27 = vmul.f32 %v4018_v24, %v4014_v16 }
 0x825   : > { %v4020_v25 = vpop.eup %4019 }
 0x826   : > { %v2005_v26 = vmul.f32 %v4020_v25, %v4016_v18  ;;  %v2798_v18 = vld [vmem:[#allocation20 + $0x30] sm:$0xff] }
 0x828   : > { %3772 = vmatprep.mubr.msk.f32.mxu1 %vm891_vm2, %v2005_v26 }
 0x829   : > { %3773 = vmatmul.mubr.msk.f32.vlgmr.msra.gmra.mxu1 %vm891_vm2, %v2007_v27 }
 0x82a   : > { %3781 = vmatpush3.msra.mxu1 %v1357_v23  ;;  %3782 = vmatprep.mubr.msk.f32.mxu1 %vm891_vm2, %v1713_v55 }
 0x82b   : > { %3790 = vmatprep.subr.mxu1 %v4944_v50 }
 0x82d   : > { %3783 = vmatmul.mubr.msk.f32.vlgmr.msra.gmra.mxu1 %vm891_vm2, %v3750_v53 }
 0x82e   : > { %3791 = vmatpush3.msra.mxu1 %v4944_v50  ;;  %3794 = vmatprep.mubr.msk.f32.mxu1 %vm953_vm3, %v2345_v28 }
 0x82f   : > { %3792 = vmatprep.subr.mxu1 %v4942_v49 }
 0x830   : > { %3793 = vmatpush3.msra.mxu1 %v4942_v49 }
 0x831   : > { %3795 = vmatmul.mubr.msk.f32.vlgmr.msra.gmra.mxu1 %vm953_vm3, %v2346_v29 }
 0x8e9   : > { %v3774_v30 = vpop.f32.mrf.mxu1 }
 0x8eb   : > { %v2084_v31 = vpop.f32.mrf.mxu1 }
 0x8ec   : > { %3777 = vmatprep.mubr.msk.f32.mxu0 %vm891_vm2, %v2084_v31 }
 0x8ed   : > { %3778 = vmatmul.mubr.msk.f32.vlgmr.msra.gmra.mxu0 %vm891_vm2, %v3774_v30  ;;  %v5088_v37 = vpop.f32.mrf.mxu1 }
 0x8ee   : > { %3786 = vmatpush3.xpose.msk.msra.mxu0 %vm891_vm2, %v2260_v15  ;;  %3787 = vmatprep.mubr.msk.f32.mxu0 %vm891_vm2, %v2256_v32  ;;  %v3552_v15 = vld [vmem:[%s5310_s16 + $0x38] sm:$0xff] }
 0x8ef   : > { %3797 = vmatprep.subr.mxu0 %v4944_v50  ;;  %v5092_v39 = vpop.f32.mrf.mxu1 }
 0x8f1   : > { %3788 = vmatmul.mubr.msk.f32.vlgmr.msra.gmra.mxu0 %vm891_vm2, %v2258_v34  ;;  %v3796_v42 = vpop.f32.mrf.mxu1 }
 0x8f2   : > { %3798 = vmatpush3.msra.mxu0 %v4944_v50  ;;  %3801 = vmatprep.mubr.msk.f32.mxu0 %vm953_vm3, %v3536_v33 }
 0x8f3   : > { %3799 = vmatprep.subr.mxu0 %v4942_v49  ;;  %v2419_v47 = vpop.f32.mrf.mxu1 }
 0x8f4   : > { %3800 = vmatpush3.msra.mxu0 %v4942_v49 }
 0x8f5   : > { %3809 = vmatprep.subr.mxu0 %v1359_v35  ;;  %3802 = vmatmul.mubr.msk.f32.vlgmr.msra.gmra.mxu0 %vm953_vm3, %v3537_v36 }
 0x8f6   : > { %3810 = vmatpush3.msra.mxu0 %v1359_v35 }
 0x8f7   : > { %3819 = vmatprep.subr.mxu0 %v4944_v50 }
 0x9ad   : > { %v5090_v38 = vpop.f32.mrf.mxu0 }
 0x9ae   : > { %v2252_v21 = vadd.f32 %v5088_v37, %v5090_v38 }
 0x9af   : > { %v5094_v40 = vpop.f32.mrf.mxu0 }
 0x9b0   : > { %v2247_v23 = vadd.f32 %v5092_v39, %v5094_v40 }
 0x9b1   : > { %v3789_v41 = vpop.f32.mrf.mxu0 }
 0x9b2   : > { %v2343_v43 = vmul.f32 0.35355338, %v3789_v41 }
 0x9b3   : > { %v2333_v44 = vpop.f32.mrf.mxu0 }
 0x9b4   : > { %v2513_v45 = vmul.f32 %v3796_v42, %v2343_v43  ;;  %v2342_v46 = vmul.f32 0.35355338, %v2333_v44 }
 0x9b5   : > { %v3803_v48 = vpop.f32.mrf.mxu0 }
 0x9b6   : > { %v2512_v51 = vmul.f32 %v2419_v47, %v2342_v46  ;;  %v2515_v52 = vadd.f32 %v3803_v48, %v2513_v45 }
 0x9b7   : > { %v2503_v53 = vpop.f32.mrf.mxu0 }
 0x9b8   : > { %3541 = vst.msk [vmem:[%s5004_s7 + $0x28] sm:$0xff] %vm891_vm2, %v2515_v52  ;;  %v2514_v54 = vadd.f32 %v2512_v51, %v2503_v53  ;;  %v2522_v55 = vsel %vm891_vm2, %v2515_v52, -inf }
 0x9b9   : > { %2523 = vmax.xlane.f32.xlu1 %v2522_v55 }
 0x9ba   : > { %3540 = vst.msk [vmem:[%s5004_s7 + $0x20] sm:$0xff] %vm891_vm2, %v2514_v54  ;;  %v2519_v56 = vsel %vm891_vm2, %v2514_v54, -inf }
 0x9bb   : > { %2520 = vmax.xlane.f32.xlu0 %v2519_v56 }
 0x9ca   : > { %2712 = vrot.lane.b32.xlu1 %v4979_v4, %s4463_s28 }
 0x9ce   : > { %2708 = vrot.lane.b32.xlu1 %v4967_v63, %s4463_s28 }
 0x9d2   : > { %2710 = vrot.lane.b32.xlu1 %v4985_v7, %s4463_s28 }
 0xa42   : > { %v2524_v57 = vpop.xlane.xlu1 %2523 }
 0xa43   : > { %v2526_v58 = vsub.f32 %v2515_v52, %v2524_v57  ;;  %v1360_v57 = vld [vmem:[#allocation17 + $0x18] sm:$0xff] }
 0xa44   : > { %v2521_v59 = vpop.xlane.xlu0 %2520 }
 0xa45   : > { %v2529_v60 = vmul.f32 1.442695, %v2526_v58  ;;  %v2525_v61 = vsub.f32 %v2514_v54, %v2521_v59 }
 0xa46   : > { %v2713_v5 = vpop.permute.xlu1 %2712 }
 0xa47   : > { %4021 = vpow2.f32 %v2529_v60  ;;  %v2527_v62 = vmul.f32 1.442695, %v2525_v61  ;;  %v3561_v60 = vld [vmem:[#allocation19] ss:$0 sm:$0xff] }
 0xa49   : > { %4023 = vpow2.f32 %v2527_v62 }
 0xa4a   : > { %v2709_v9 = vpop.permute.xlu1 %2708 }
 0xa4e   : > { %v2711_v13 = vpop.permute.xlu1 %2710 }
 0xa54   : > { %v4022_v0 = vpop.eup %4021 }
 0xa55   : > { %v2534_v1 = vsel %vm891_vm2, %v4022_v0, 0.0 }
 0xa56   : > { %v4024_v2 = vpop.eup %4023  ;;  %2535 = vadd.xlane.f32.xlu0 %v2534_v1 }
 0xa57   : > { %v2531_v4 = vsel %vm891_vm2, %v4024_v2, 0.0 }
 0xa5a   : > { %2532 = vadd.xlane.f32.xlu0 %v2531_v4 }
 0xa70   : > { %2541 = vrot.lane.b32.xlu0 %v4992_v12, %s4462_s19  ;;  %s4359_s19 = sshll.u32 %s4464_s24, 4  ;;  %s4360_s19 = int_to_ptr.vmem [resolvable:$false] %s4359_s19 }
 0xa71   : > { %s4361_s29 = scalar_lea.vmem %s4360_s19, 512 }
 0xadf   : > { %v2536_v63 = vpop.xlane.xlu0 %2535 }
 0xae0   : > { %4025 = vrcp.f32 %v2536_v63 }
 0xae3   : > { %v2533_v7 = vpop.xlane.xlu0 %2532 }
 0xae4   : > { %4027 = vrcp.f32 %v2533_v7 }
 0xae7   : > { %v2542_v3 = vpop.permute.xlu0 %2541 }
 0xae8   : > { %3804 = vmatprep.subr.mxu1 %v2542_v3 }
 0xae9   : > { %3805 = vmatpush3.msra.mxu1 %v2542_v3 }
 0xaea   : > { %3814 = vmatprep.subr.msk.mxu1 %vm891_vm2, %v2713_v5 }
 0xaed   : > { %v4026_v6 = vpop.eup %4025 }
 0xaee   : > { %v2540_v11 = vmul.f32 %v4026_v6, %v4022_v0 }
 0xaf1   : > { %v4028_v8 = vpop.eup %4027 }
 0xaf2   : > { %v2538_v10 = vmul.f32 %v4028_v8, %v4024_v2 }
 0xaf4   : > { %3806 = vmatprep.mubr.msk.f32.mxu1 %vm891_vm2, %v2538_v10 }
 0xaf5   : > { %3807 = vmatmul.mubr.msk.f32.vlgmr.msra.gmra.mxu1 %vm891_vm2, %v2540_v11 }
 0xaf6   : > { %3815 = vmatpush3.xpose.msk.msra.mxu1 %vm891_vm2, %v2713_v5  ;;  %3816 = vmatprep.mubr.msk.f32.mxu1 %vm891_vm2, %v2709_v9 }
 0xaf7   : > { %3826 = vmatprep.subr.mxu1 %v4944_v50 }
 0xaf9   : > { %3817 = vmatmul.mubr.msk.f32.vlgmr.msra.gmra.mxu1 %vm891_vm2, %v2711_v13 }
 0xafa   : > { %3827 = vmatpush3.msra.mxu1 %v4944_v50  ;;  %3830 = vmatprep.mubr.msk.f32.mxu1 %vm953_vm3, %v3551_v14 }
 0xafb   : > { %3828 = vmatprep.subr.mxu1 %v4942_v49 }
 0xafc   : > { %3829 = vmatpush3.msra.mxu1 %v4942_v49 }
 0xafd   : > { %3831 = vmatmul.mubr.msk.f32.vlgmr.msra.gmra.mxu1 %vm953_vm3, %v3552_v15  ;;  %3838 = vmatprep.subr.mxu1 %v1360_v57 }
 0xafe   : > { %3839 = vmatpush3.msra.mxu1 %v1360_v57 }
 0xbb5   : > { %v3808_v16 = vpop.f32.mrf.mxu1 }
 0xbb7   : > { %v2616_v17 = vpop.f32.mrf.mxu1 }
 0xbb8   : > { %3811 = vmatprep.mubr.msk.f32.mxu0 %vm891_vm2, %v2616_v17 }
 0xbb9   : > { %3812 = vmatmul.mubr.msk.f32.vlgmr.msra.gmra.mxu0 %vm891_vm2, %v3808_v16  ;;  %v3818_v20 = vpop.f32.mrf.mxu1 }
 0xbba   : > { %3820 = vmatpush3.msra.mxu0 %v4944_v50  ;;  %3823 = vmatprep.mubr.msk.f32.mxu0 %vm953_vm3, %v2798_v18  ;;  %v2796_v26 = vmul.f32 0.35355338, %v3818_v20 }
 0xbbb   : > { %3821 = vmatprep.subr.mxu0 %v4942_v49  ;;  %v2786_v50 = vpop.f32.mrf.mxu1 }
 0xbbc   : > { %3822 = vmatpush3.msra.mxu0 %v4942_v49  ;;  %v2795_v49 = vmul.f32 0.35355338, %v2786_v50 }
 0xbbd   : > { %3824 = vmatmul.mubr.msk.f32.vlgmr.msra.gmra.mxu0 %vm953_vm3, %v2799_v19  ;;  %v3832_v29 = vpop.f32.mrf.mxu1 }
 0xbbf   : > { %v2956_v34 = vpop.f32.mrf.mxu1 }
 0xc79   : > { %v3813_v22 = vpop.f32.mrf.mxu0 }
 0xc7a   : > { %v2707_v24 = vadd.f32 %v3813_v22, %v2252_v21 }
 0xc7b   : > { %v2697_v25 = vpop.f32.mrf.mxu0 }
 0xc7c   : > { %v2706_v27 = vadd.f32 %v2697_v25, %v2247_v23 }
 0xc7d   : > { %v3825_v28 = vpop.f32.mrf.mxu0 }
 0xc7e   : > { %v2966_v30 = vmul.f32 %v3825_v28, %v2796_v26 }
 0xc7f   : > { %v2872_v31 = vpop.f32.mrf.mxu0 }
 0xc80   : > { %v2968_v32 = vadd.f32 %v3832_v29, %v2966_v30  ;;  %v2965_v33 = vmul.f32 %v2872_v31, %v2795_v49 }
 0xc82   : > { %3556 = vst.msk [vmem:[%s5004_s7 + $0x38] sm:$0xff] %vm891_vm2, %v2968_v32  ;;  %v2967_v35 = vadd.f32 %v2965_v33, %v2956_v34  ;;  %v2975_v36 = vsel %vm891_vm2, %v2968_v32, -inf }
 0xc83   : > { %2976 = vmax.xlane.f32.xlu1 %v2975_v36 }
 0xc84   : > { %3555 = vst.msk [vmem:[%s5004_s7 + $0x30] sm:$0xff] %vm891_vm2, %v2967_v35  ;;  %v2972_v37 = vsel %vm891_vm2, %v2967_v35, -inf  ;;  %s3196_s7 = sshll.u32 %s767_s22, 4  ;;  %s5162_s7 = int_to_ptr.vmem [resolvable:$true] %s3196_s7 }
 0xc85   : > { %2973 = vmax.xlane.f32.xlu0 %v2972_v37  ;;  %s4355_s9 = scalar_lea.vmem %s5162_s7, 256  ;;  %p4362_p6 = scmp.lt.s32.totalorder %s5162_s7, %s4360_s19 }
 0xc86   : > { %p4356_p9 = scmp.ne.s32.totalorder %s5162_s7, %s4355_s9  ;;  %p4363_p7 = scmp.lt.s32.totalorder %s4361_s29, %s4355_s9 }
 0xc88   : > { %p4357_p4 = pnand %p4356_p9, %p5314_p3  ;;  %p4364_p0 = por %p4363_p7, %p4362_p6 }
 0xc8a   : > { %p4358_p5 = pneg %p4357_p4 }
 0xc8c   : > { %p4365_p8 = pnand %p4364_p0, %p4358_p5 }
 0xd0c   : > { %v2977_v38 = vpop.xlane.xlu1 %2976 }
 0xd0d   : > { %v2979_v39 = vsub.f32 %v2968_v32, %v2977_v38 }
 0xd0e   : > { %v2974_v40 = vpop.xlane.xlu0 %2973 }
 0xd0f   : > { %v2982_v41 = vmul.f32 1.442695, %v2979_v39  ;;  %v2978_v42 = vsub.f32 %v2967_v35, %v2974_v40 }
 0xd11   : > { %4029 = vpow2.f32 %v2982_v41  ;;  %v2980_v43 = vmul.f32 1.442695, %v2978_v42 }
 0xd13   : > { %4031 = vpow2.f32 %v2980_v43 }
 0xd1e   : > { %v4030_v44 = vpop.eup %4029 }
 0xd1f   : > { %v2987_v45 = vsel %vm891_vm2, %v4030_v44, 0.0 }
 0xd20   : > { %v4032_v46 = vpop.eup %4031  ;;  %2988 = vadd.xlane.f32.xlu0 %v2987_v45 }
 0xd21   : > { %v2984_v47 = vsel %vm891_vm2, %v4032_v46, 0.0 }
 0xd24   : > { %2985 = vadd.xlane.f32.xlu0 %v2984_v47 }
 0xd3a   : > { %2994 = vrot.lane.b32.xlu0 %v4992_v12, %s4463_s28 }
 0xda9   : > { %v2989_v48 = vpop.xlane.xlu0 %2988 }
 0xdaa   : > { %4033 = vrcp.f32 %v2989_v48 }
 0xdad   : > { %v2986_v51 = vpop.xlane.xlu0 %2985 }
 0xdae   : > { %4035 = vrcp.f32 %v2986_v51 }
 0xdb1   : > { %v2995_v52 = vpop.permute.xlu0 %2994 }
 0xdb2   : > { %3833 = vmatprep.subr.mxu0 %v2995_v52 }
 0xdb3   : > { %3834 = vmatpush3.msra.mxu0 %v2995_v52 }
 0xdb7   : > { %v4034_v53 = vpop.eup %4033 }
 0xdb8   : > { %v2993_v56 = vmul.f32 %v4034_v53, %v4030_v44 }
 0xdbb   : > { %v4036_v54 = vpop.eup %4035 }
 0xdbc   : > { %v2991_v55 = vmul.f32 %v4036_v54, %v4032_v46 }
 0xdbe   : > { %3835 = vmatprep.mubr.msk.f32.mxu0 %vm891_vm2, %v2991_v55 }
 0xdbf   : > { %3836 = vmatmul.mubr.msk.f32.vlgmr.msra.gmra.mxu0 %vm891_vm2, %v2993_v56 }
 0xe7f   : > { %v3837_v12 = vpop.f32.mrf.mxu0 }
 0xe81   : > { %v3069_v58 = vpop.f32.mrf.mxu0 }
 0xe82   : > { %3840 = vmatprep.mubr.msk.f32.mxu1 %vm891_vm2, %v3069_v58 }
 0xe83   : > { %3841 = vmatmul.mubr.msk.f32.vlgmr.msra.gmra.mxu1 %vm891_vm2, %v3837_v12 }
 0xf43   : > { %v3842_v59 = vpop.f32.mrf.mxu1 }
 0xf44   : > { %v3160_v61 = vadd.f32 %v3842_v59, %v2707_v24 }
 0xf45   : > { %v3150_v62 = vpop.f32.mrf.mxu1 }
 0xf46   : > { %v3169_v0 = vadd.f32 %v3561_v60, %v3160_v61  ;;  %v3159_v1 = vadd.f32 %v3150_v62, %v2706_v27 }
 0xf48   : > { %3171 = vst.msk [vmem:[%s767_s22 + $0x8] sm:$0xff] %vm809_vm0, %v3169_v0  ;;  %v3168_v2 = vadd.f32 %v3561_v60, %v3159_v1 }
 0xf4a   : > { %3170 = vst.msk [vmem:[%s767_s22] sm:$0xff] %vm809_vm0, %v3168_v2 }
 0xf4b   : > { %4368 = shalt.err (!%p4365_p8)
}
 0xf4c   : > { %s4369_s20 = scalar_lea.hbm %s5160_s15, 256  ;;  %s4373_s28 = scalar_lea.hbm %s5313_s17, 512 }
 0xf4d   : > { %p4370_p10 = scmp.ne.s32.totalorder %s5160_s15, %s4369_s20  ;;  %p4374_p13 = scmp.lt.s32.totalorder %s5160_s15, %s5313_s17 }
 0xf4e   : > { %p4375_p11 = scmp.lt.s32.totalorder %s4373_s28, %s4369_s20 }
 0xf4f   : > { %p4371_p1 = pnand %p4370_p10, %p5314_p3 }
 0xf50   : > { %p4376_p2 = por %p4375_p11, %p4374_p13 }
 0xf51   : > { %p4372_p12 = pneg %p4371_p1 }
 0xf53   : > { %p4377_p9 = pnand %p4376_p2, %p4372_p12 }
 0xf55   : > { %4380 = shalt.err (!%p4377_p9)
}
 0xf56   : > { %s4465_s11 = smov 128   ;;  %s4466_s6 = smov 8  }
 0xf57   : > { %3885 = dma.vmem_to_hbm [thread:$0]  (%p5314_p3), %s5162_s7, 256, %s5160_s15, %s3173_s0, %s4465_s11, %s4465_s11, %s4466_s6  }
 0xf58 PF: > { %s5315_s23 = sld [smem:[#allocation31_spill]] }
 0xf59   : > { %s5316_s22 = sld [smem:[#allocation36_spill]] }
 0xf5a   : > { %s5317_s1 = sld [smem:[#allocation32_spill]] }
 0xf5e   : > { %s3217_s18 = sand.u32 1, %s5315_s23  }
 0xf5f   : > { %p5318_p4 = scmp.ne.s32.totalorder %s5316_s22, 0  ;;  %s3218_s9 = scalar_lea.sflag [#allocation4], %s3217_s18 }
 0xf60   : > { %p5319_p5 = scmp.ge.s32.totalorder %s5317_s1, 2 }
 0xf62   : > { %p3926_p6 = pnand %p5319_p5, %p5318_p4 }
 0xf64   : > { %p3927_p7 = pneg %p3926_p6 }
 0xf66   : > { %4426 = dma.done.wait (%p3927_p7), %s3218_s9, 256  }
 0xf67   : > { %4428 = vsyncadd (%p3927_p7), %s3218_s9, 4294967040  ;;  %s5320_s27 = sld [smem:[#allocation33_spill]]  ;;  %s5322_s24 = smov %s4435_s25 }
 0xf68   : > { %s5321_s19 = sld [smem:[#allocation34_spill]]  ;;  %s5323_s25 = smov %s4439_s26 }
 0xf6d   : > { %p39_p0 = scmp.ge.s32.totalorder %s5320_s27, 4  }
 0xf6e   : > { %s5324_s26 = smov %s5321_s19 }
 0xf6f   :  { %41 = sbr.rel (!%p39_p0) target bundleno = 26 (0x1a), region = 218 }
 0xf74   :  { %3239 = vsyncpa [#allocation3], 1 }
 0xf75   :  { %3241 = vsyncpa [#allocation3 + $0x1], 1 }
 0xf76   :  { %3242 = vsyncpa [#allocation6], 1 }
 0xf77   :  { %3244 = vsyncpa [#allocation6 + $0x1], 1 }
 0xf78   :  { %3245 = vsyncpa [#allocation9], 1 }
 0xf79   :  { %3246 = vsyncpa [#allocation12], 1 }
 0xf7a   :  { %3247 = vsyncpa [#allocation15], 1 }
 0xf7b   :  { %3248 = vsyncpa [#allocation18], 1 }
 0xf7c   :  { %3249 = vsyncpa [#allocation21], 1 }
 0xf7d   :  { %3250 = vsyncpa [#allocation4], 1 }
 0xf7e   :  { %3252 = vsyncpa [#allocation4 + $0x1], 1 }

</bundles_post_ra>
